<compile_context>
chip_gen: v6e
topology: v6e:2x2x1
jax: 0.10.0
libtpu: 0.0.40
codegen_flags: <defaults>
</compile_context>

<pallas_src>
import jax
import jax.numpy as jnp
from jax import lax
from jax.experimental import pallas as pl
from jax.experimental.pallas import tpu as pltpu

EPS = 1e-5
LANE = 128  # lane-dense padding for the final (out_dim=3) projection


def _decoder_kernel(
    x_ref,
    w1_ref, s1_ref, g1_ref, be1_ref,
    w2_ref, s2_ref, g2_ref, be2_ref,
    w3_ref, b3_ref,
    out_ref,
):
    x = x_ref[...]                       # (B, 1024) f32
    inv_b = 1.0 / x.shape[0]             # static batch size

    def bn_relu(hq, s_ref, g_ref, be_ref):
        # hq = x @ w_quant (f32 accum, NOT dequantized).  s is the
        # per-output-channel dequant scale; folding it into the BN affine
        # makes dequantization free.  Single-pass stats, biased variance
        # (PyTorch train-mode BatchNorm1d semantics).
        s = s_ref[...]
        mean = jnp.sum(hq, axis=0, keepdims=True) * inv_b
        var = jnp.maximum(
            jnp.sum(hq * hq, axis=0, keepdims=True) * inv_b - mean * mean, 0.0)
        scale = (g_ref[...] * s) * lax.rsqrt(var * (s * s) + EPS)
        shift = be_ref[...] - mean * scale
        return jnp.maximum(hq * scale + shift, 0.0)

    # --- block 1: Linear(1024->512, bias dropped) + BN(512) + ReLU ----------
    h = jnp.dot(x.astype(jnp.bfloat16), w1_ref[...].astype(jnp.bfloat16),
                preferred_element_type=jnp.float32)
    h = bn_relu(h, s1_ref, g1_ref, be1_ref)

    # --- block 2: Linear(512->256, bias dropped) + BN(256) + ReLU -----------
    h = jnp.dot(h.astype(jnp.bfloat16), w2_ref[...].astype(jnp.bfloat16),
                preferred_element_type=jnp.float32)
    h = bn_relu(h, s2_ref, g2_ref, be2_ref)

    # --- block 3: Linear(256->128 padded) + Tanh, lane-dense bf16 store -----
    h = jnp.dot(h.astype(jnp.bfloat16), w3_ref[...],
                preferred_element_type=jnp.float32) + b3_ref[...]
    out_ref[...] = jnp.tanh(h).astype(out_ref.dtype)


def _narrow_weight_dtype():
    """Generation-aware narrow storage dtype for w1/w2 (DMA-bound kernel)."""
    kind = jax.devices()[0].device_kind.lower()
    if "v7" in kind or "7x" in kind:
        return jnp.float8_e4m3fn       # v7x MXU has no int path; fp8 is native
    return jnp.int8                    # v5e / v6e (and default)


def _quantize_per_channel(w, dtype):
    """Symmetric per-output-channel quantization. Returns (w_q, scale[1,N])."""
    amax = jnp.maximum(jnp.max(jnp.abs(w), axis=0, keepdims=True), 1e-12)
    if dtype == jnp.int8:
        s = amax / 127.0
        wq = jnp.clip(jnp.round(w / s), -127.0, 127.0).astype(jnp.int8)
    else:  # float8_e4m3fn
        s = amax / 448.0
        wq = (w / s).astype(dtype)
    return wq, s.astype(jnp.float32)


def prepare_kernel_params(params, narrow_dtype=None):
    """One-time packing of the f32 module params into kernel form:
    narrow-quantized w1/w2 (+ per-channel scales), b1/b2 dropped (cancelled
    by train-mode BN), w3/b3 zero-padded to 128 lanes, w3 in bf16."""
    if narrow_dtype is None:
        narrow_dtype = _narrow_weight_dtype()
    w1q, s1 = _quantize_per_channel(params["w1"], narrow_dtype)
    w2q, s2 = _quantize_per_channel(params["w2"], narrow_dtype)
    fin3, fout3 = params["w3"].shape
    w3p = jnp.zeros((fin3, LANE), jnp.float32).at[:, :fout3].set(params["w3"])
    b3p = jnp.zeros((1, LANE), jnp.float32).at[:, :fout3].set(params["b3"])
    return {
        "w1": w1q, "s1": s1, "g1": params["g1"], "be1": params["be1"],
        "w2": w2q, "s2": s2, "g2": params["g2"], "be2": params["be2"],
        "w3": w3p.astype(jnp.bfloat16), "b3": b3p,
        "out_dim": fout3,
    }


def decoder_forward(x, kp):
    """x: (B, input_dim) float32, B >= 2 (train-mode BN). kp: prepared params."""
    B = x.shape[0]
    out_dim = kp["out_dim"]

    operands = (x,
                kp["w1"], kp["s1"], kp["g1"], kp["be1"],
                kp["w2"], kp["s2"], kp["g2"], kp["be2"],
                kp["w3"], kp["b3"])

    flops = 2 * B * (kp["w1"].shape[0] * kp["w1"].shape[1]
                     + kp["w2"].shape[0] * kp["w2"].shape[1]
                     + kp["w3"].shape[0] * kp["w3"].shape[1])
    bytes_accessed = sum(int(a.size) * a.dtype.itemsize for a in operands)
    bytes_accessed += B * LANE * 2  # bf16 output
    transcendentals = B * LANE + kp["w1"].shape[1] + kp["w2"].shape[1]

    out_padded = pl.pallas_call(
        _decoder_kernel,
        out_shape=jax.ShapeDtypeStruct((B, LANE), jnp.bfloat16),
        # Tiny problem: gridless, every operand resident whole in VMEM.
        in_specs=[pl.BlockSpec(memory_space=pltpu.MemorySpace.VMEM)]
                 * len(operands),
        out_specs=pl.BlockSpec(memory_space=pltpu.MemorySpace.VMEM),
        compiler_params=pltpu.CompilerParams(
            vmem_limit_bytes=32 * 1024 * 1024),
        cost_estimate=pl.CostEstimate(
            flops=flops,
            transcendentals=transcendentals,
            bytes_accessed=bytes_accessed),
    )(*operands)
    return out_padded[:, :out_dim].astype(jnp.float32)


def init_params(key, input_dim=1024, out_dim=3):
    """f32 params mirroring the PyTorch module's init:
    Linear: U(-1/sqrt(fan_in), 1/sqrt(fan_in)); BN: gamma=1, beta=0."""
    feats = [512, 256]
    dims = [(input_dim, feats[0]), (feats[0], feats[1]), (feats[1], out_dim)]
    keys = jax.random.split(key, 6)
    params = {}
    for i, (fin, fout) in enumerate(dims, start=1):
        bound = 1.0 / (fin ** 0.5)
        params[f"w{i}"] = jax.random.uniform(
            keys[2 * (i - 1)], (fin, fout), jnp.float32, -bound, bound)
        params[f"b{i}"] = jax.random.uniform(
            keys[2 * (i - 1) + 1], (1, fout), jnp.float32, -bound, bound)
    params["g1"] = jnp.ones((1, feats[0]), jnp.float32)
    params["be1"] = jnp.zeros((1, feats[0]), jnp.float32)
    params["g2"] = jnp.ones((1, feats[1]), jnp.float32)
    params["be2"] = jnp.zeros((1, feats[1]), jnp.float32)
    return params


# ----------------------------- references -----------------------------------

def _bn_ref(h, g, be):
    m = jnp.mean(h, 0, keepdims=True)
    v = jnp.mean((h - m) * (h - m), 0, keepdims=True)
    return (h - m) / jnp.sqrt(v + EPS) * g + be


def _reference_f32(x, p):
    """Original module semantics, full f32, biases included."""
    h = jnp.maximum(_bn_ref(x @ p["w1"] + p["b1"], p["g1"], p["be1"]), 0.0)
    h = jnp.maximum(_bn_ref(h @ p["w2"] + p["b2"], p["g2"], p["be2"]), 0.0)
    return jnp.tanh(h @ p["w3"] + p["b3"])


def _reference_kernel_numerics(x, p, kp):
    """Mirrors the kernel math (quantized weights, bf16 matmul inputs, f32
    accumulation, dequant scale folded into BN, single-pass stats, bf16
    output) but KEEPS the original b1/b2 biases, verifying that they are
    cancelled by the batch-mean subtraction inside train-mode BatchNorm."""
    bf, f32 = jnp.bfloat16, jnp.float32

    def block(h_in, wq, s, b, g, be):
        hq = jnp.dot(h_in.astype(bf), wq.astype(bf),
                     preferred_element_type=f32)
        hq = hq + b / s  # bias in quantized units; cancelled by BN centering
        mean = jnp.mean(hq, 0, keepdims=True)
        var = jnp.maximum(jnp.mean(hq * hq, 0, keepdims=True) - mean * mean,
                          0.0)
        scale = (g * s) * lax.rsqrt(var * (s * s) + EPS)
        shift = be - mean * scale
        return jnp.maximum(hq * scale + shift, 0.0)

    h = block(x, kp["w1"], kp["s1"], p["b1"], p["g1"], p["be1"])
    h = block(h, kp["w2"], kp["s2"], p["b2"], p["g2"], p["be2"])
    h = jnp.dot(h.astype(bf), kp["w3"], preferred_element_type=f32) + kp["b3"]
    return jnp.tanh(h).astype(bf).astype(f32)[:, :kp["out_dim"]]


if __name__ == "__main__":
    key = jax.random.PRNGKey(0)
    pkey, xkey = jax.random.split(key)

    B, INPUT_DIM, OUT_DIM = 8, 1024, 3   # B >= 2 required (train-mode BN)
    params = init_params(pkey, input_dim=INPUT_DIM, out_dim=OUT_DIM)
    kparams = prepare_kernel_params(params)
    x = jax.random.normal(xkey, (B, INPUT_DIM), jnp.float32)

    out = decoder_forward(x, kparams)
    out = jax.block_until_ready(out)
    assert out.shape == (B, OUT_DIM)

    # Tight check vs a reference reproducing the kernel's quantized/bf16
    # numerics (with the original biases, confirming bias-before-BN
    # cancellation).  Slack covers bf16 output rounding (~4e-3).
    ref_q = _reference_kernel_numerics(x, params, kparams)
    err_q = float(jnp.max(jnp.abs(out - ref_q)))
    assert err_q < 8e-3, err_q

    # Loose sanity check vs exact f32 module semantics (covers int8/fp8 weight
    # quantization + bf16 matmul/output error only).
    ref_f32 = _reference_f32(x, params)
    err_f = float(jnp.max(jnp.abs(out - ref_f32)))
    assert err_f < 0.1, err_f

    print("KERNEL_OK")
</pallas_src>

<mosaic_0001>
module attributes {stable_mosaic.version = 11 : i64} {
  func.func @_decoder_kernel(%arg0: memref<8x1024xf32, #tpu.memory_space<vmem>>, %arg1: memref<1024x512xi8, #tpu.memory_space<vmem>>, %arg2: memref<1x512xf32, #tpu.memory_space<vmem>>, %arg3: memref<1x512xf32, #tpu.memory_space<vmem>>, %arg4: memref<1x512xf32, #tpu.memory_space<vmem>>, %arg5: memref<512x256xi8, #tpu.memory_space<vmem>>, %arg6: memref<1x256xf32, #tpu.memory_space<vmem>>, %arg7: memref<1x256xf32, #tpu.memory_space<vmem>>, %arg8: memref<1x256xf32, #tpu.memory_space<vmem>>, %arg9: memref<256x128xbf16, #tpu.memory_space<vmem>>, %arg10: memref<1x128xf32, #tpu.memory_space<vmem>>, %arg11: memref<8x128xbf16, #tpu.memory_space<vmem>>) attributes {dimension_semantics = [], scalar_prefetch = 0 : i64, scratch_operands = 0 : i64, tpu.core_type = #tpu.core_type<tc>} {
    %c0 = arith.constant 0 : index
    %c0_0 = arith.constant 0 : index
    %0 = vector.load %arg0[%c0, %c0_0] : memref<8x1024xf32, #tpu.memory_space<vmem>>, vector<8x1024xf32>
    %1 = arith.truncf %0 : vector<8x1024xf32> to vector<8x1024xbf16>
    %c0_1 = arith.constant 0 : index
    %c0_2 = arith.constant 0 : index
    %2 = vector.load %arg1[%c0_1, %c0_2] : memref<1024x512xi8, #tpu.memory_space<vmem>>, vector<1024x512xi8>
    %3 = arith.sitofp %2 : vector<1024x512xi8> to vector<1024x512xbf16>
    %cst = arith.constant dense<0.000000e+00> : vector<8x512xf32>
    %4 = tpu.matmul %1, %3, %cst {dimension_numbers = #tpu.dot_dimension_numbers<[1], [0], [0], [1], [0, 0, 1, 1], [], []>} : vector<8x1024xbf16>, vector<1024x512xbf16>, vector<8x512xf32> -> vector<8x512xf32>
    %c0_3 = arith.constant 0 : index
    %c0_4 = arith.constant 0 : index
    %5 = vector.load %arg2[%c0_3, %c0_4] : memref<1x512xf32, #tpu.memory_space<vmem>>, vector<1x512xf32>
    %cst_5 = arith.constant dense<0.000000e+00> : vector<512xf32>
    %6 = vector.multi_reduction <add>, %4, %cst_5 [0] : vector<8x512xf32> to vector<512xf32>
    %7 = vector.shape_cast %6 : vector<512xf32> to vector<1x512xf32>
    %cst_6 = arith.constant 1.250000e-01 : f32
    %8 = vector.broadcast %cst_6 : f32 to vector<1x512xf32>
    %9 = arith.mulf %7, %8 : vector<1x512xf32>
    %10 = arith.mulf %4, %4 : vector<8x512xf32>
    %cst_7 = arith.constant dense<0.000000e+00> : vector<512xf32>
    %11 = vector.multi_reduction <add>, %10, %cst_7 [0] : vector<8x512xf32> to vector<512xf32>
    %12 = vector.shape_cast %11 : vector<512xf32> to vector<1x512xf32>
    %cst_8 = arith.constant 1.250000e-01 : f32
    %13 = vector.broadcast %cst_8 : f32 to vector<1x512xf32>
    %14 = arith.mulf %12, %13 : vector<1x512xf32>
    %15 = arith.mulf %9, %9 : vector<1x512xf32>
    %16 = arith.subf %14, %15 : vector<1x512xf32>
    %cst_9 = arith.constant 0.000000e+00 : f32
    %17 = vector.broadcast %cst_9 : f32 to vector<1x512xf32>
    %18 = arith.maximumf %16, %17 : vector<1x512xf32>
    %c0_10 = arith.constant 0 : index
    %c0_11 = arith.constant 0 : index
    %19 = vector.load %arg3[%c0_10, %c0_11] : memref<1x512xf32, #tpu.memory_space<vmem>>, vector<1x512xf32>
    %20 = arith.mulf %19, %5 : vector<1x512xf32>
    %21 = arith.mulf %5, %5 : vector<1x512xf32>
    %22 = arith.mulf %18, %21 : vector<1x512xf32>
    %cst_12 = arith.constant 9.99999974E-6 : f32
    %23 = vector.broadcast %cst_12 : f32 to vector<1x512xf32>
    %24 = arith.addf %22, %23 : vector<1x512xf32>
    %25 = math.rsqrt %24 : vector<1x512xf32>
    %26 = arith.mulf %20, %25 : vector<1x512xf32>
    %c0_13 = arith.constant 0 : index
    %c0_14 = arith.constant 0 : index
    %27 = vector.load %arg4[%c0_13, %c0_14] : memref<1x512xf32, #tpu.memory_space<vmem>>, vector<1x512xf32>
    %28 = arith.mulf %9, %26 : vector<1x512xf32>
    %29 = arith.subf %27, %28 : vector<1x512xf32>
    %30 = vector.broadcast %26 : vector<1x512xf32> to vector<8x512xf32>
    %31 = arith.mulf %4, %30 : vector<8x512xf32>
    %32 = vector.broadcast %29 : vector<1x512xf32> to vector<8x512xf32>
    %33 = arith.addf %31, %32 : vector<8x512xf32>
    %cst_15 = arith.constant 0.000000e+00 : f32
    %34 = vector.broadcast %cst_15 : f32 to vector<8x512xf32>
    %35 = arith.maximumf %33, %34 : vector<8x512xf32>
    %36 = arith.truncf %35 : vector<8x512xf32> to vector<8x512xbf16>
    %c0_16 = arith.constant 0 : index
    %c0_17 = arith.constant 0 : index
    %37 = vector.load %arg5[%c0_16, %c0_17] : memref<512x256xi8, #tpu.memory_space<vmem>>, vector<512x256xi8>
    %38 = arith.sitofp %37 : vector<512x256xi8> to vector<512x256xbf16>
    %cst_18 = arith.constant dense<0.000000e+00> : vector<8x256xf32>
    %39 = tpu.matmul %36, %38, %cst_18 {dimension_numbers = #tpu.dot_dimension_numbers<[1], [0], [0], [1], [0, 0, 1, 1], [], []>} : vector<8x512xbf16>, vector<512x256xbf16>, vector<8x256xf32> -> vector<8x256xf32>
    %c0_19 = arith.constant 0 : index
    %c0_20 = arith.constant 0 : index
    %40 = vector.load %arg6[%c0_19, %c0_20] : memref<1x256xf32, #tpu.memory_space<vmem>>, vector<1x256xf32>
    %cst_21 = arith.constant dense<0.000000e+00> : vector<256xf32>
    %41 = vector.multi_reduction <add>, %39, %cst_21 [0] : vector<8x256xf32> to vector<256xf32>
    %42 = vector.shape_cast %41 : vector<256xf32> to vector<1x256xf32>
    %cst_22 = arith.constant 1.250000e-01 : f32
    %43 = vector.broadcast %cst_22 : f32 to vector<1x256xf32>
    %44 = arith.mulf %42, %43 : vector<1x256xf32>
    %45 = arith.mulf %39, %39 : vector<8x256xf32>
    %cst_23 = arith.constant dense<0.000000e+00> : vector<256xf32>
    %46 = vector.multi_reduction <add>, %45, %cst_23 [0] : vector<8x256xf32> to vector<256xf32>
    %47 = vector.shape_cast %46 : vector<256xf32> to vector<1x256xf32>
    %cst_24 = arith.constant 1.250000e-01 : f32
    %48 = vector.broadcast %cst_24 : f32 to vector<1x256xf32>
    %49 = arith.mulf %47, %48 : vector<1x256xf32>
    %50 = arith.mulf %44, %44 : vector<1x256xf32>
    %51 = arith.subf %49, %50 : vector<1x256xf32>
    %cst_25 = arith.constant 0.000000e+00 : f32
    %52 = vector.broadcast %cst_25 : f32 to vector<1x256xf32>
    %53 = arith.maximumf %51, %52 : vector<1x256xf32>
    %c0_26 = arith.constant 0 : index
    %c0_27 = arith.constant 0 : index
    %54 = vector.load %arg7[%c0_26, %c0_27] : memref<1x256xf32, #tpu.memory_space<vmem>>, vector<1x256xf32>
    %55 = arith.mulf %54, %40 : vector<1x256xf32>
    %56 = arith.mulf %40, %40 : vector<1x256xf32>
    %57 = arith.mulf %53, %56 : vector<1x256xf32>
    %cst_28 = arith.constant 9.99999974E-6 : f32
    %58 = vector.broadcast %cst_28 : f32 to vector<1x256xf32>
    %59 = arith.addf %57, %58 : vector<1x256xf32>
    %60 = math.rsqrt %59 : vector<1x256xf32>
    %61 = arith.mulf %55, %60 : vector<1x256xf32>
    %c0_29 = arith.constant 0 : index
    %c0_30 = arith.constant 0 : index
    %62 = vector.load %arg8[%c0_29, %c0_30] : memref<1x256xf32, #tpu.memory_space<vmem>>, vector<1x256xf32>
    %63 = arith.mulf %44, %61 : vector<1x256xf32>
    %64 = arith.subf %62, %63 : vector<1x256xf32>
    %65 = vector.broadcast %61 : vector<1x256xf32> to vector<8x256xf32>
    %66 = arith.mulf %39, %65 : vector<8x256xf32>
    %67 = vector.broadcast %64 : vector<1x256xf32> to vector<8x256xf32>
    %68 = arith.addf %66, %67 : vector<8x256xf32>
    %cst_31 = arith.constant 0.000000e+00 : f32
    %69 = vector.broadcast %cst_31 : f32 to vector<8x256xf32>
    %70 = arith.maximumf %68, %69 : vector<8x256xf32>
    %71 = arith.truncf %70 : vector<8x256xf32> to vector<8x256xbf16>
    %c0_32 = arith.constant 0 : index
    %c0_33 = arith.constant 0 : index
    %72 = vector.load %arg9[%c0_32, %c0_33] : memref<256x128xbf16, #tpu.memory_space<vmem>>, vector<256x128xbf16>
    %cst_34 = arith.constant dense<0.000000e+00> : vector<8x128xf32>
    %73 = tpu.matmul %71, %72, %cst_34 {dimension_numbers = #tpu.dot_dimension_numbers<[1], [0], [0], [1], [0, 0, 1, 1], [], []>} : vector<8x256xbf16>, vector<256x128xbf16>, vector<8x128xf32> -> vector<8x128xf32>
    %c0_35 = arith.constant 0 : index
    %c0_36 = arith.constant 0 : index
    %74 = vector.load %arg10[%c0_35, %c0_36] : memref<1x128xf32, #tpu.memory_space<vmem>>, vector<1x128xf32>
    %75 = vector.broadcast %74 : vector<1x128xf32> to vector<8x128xf32>
    %76 = arith.addf %73, %75 : vector<8x128xf32>
    %77 = math.tanh %76 : vector<8x128xf32>
    %78 = arith.truncf %77 : vector<8x128xf32> to vector<8x128xbf16>
    %c0_37 = arith.constant 0 : index
    %c0_38 = arith.constant 0 : index
    %79 = vector.load %arg11[%c0_37, %c0_38] : memref<8x128xbf16, #tpu.memory_space<vmem>>, vector<8x128xbf16>
    tpu.vector_store %arg11[%c0_37, %c0_38], %78 {strides = array<i32>} : memref<8x128xbf16, #tpu.memory_space<vmem>>, vector<8x128xbf16>,
    return
  }
}

</mosaic_0001>

<bundles_post_ra>
// kernel: tpu_custom_call.1
= control target key start
LH: loop header
LB: loop body
LE: loop exit
PB: predicated region body
PF: predicated region fallthrough
CT: control target
= control target key end

     0   :  { %16 = vsyncpa [#allocation3], 0  ;;  %s2065_s0 = inlined_call_operand.hbm [shape: f32[8,1024], index: 0, kind: input, shape index: {}]   ;;  %s2066_s1 = inlined_call_operand.hbm [shape: s8[1024,512], index: 1, kind: input, shape index: {}]   ;;  %s2067_s2 = inlined_call_operand.hbm [shape: f32[1,512], index: 2, kind: input, shape index: {}]   ;;  %s2068_s3 = inlined_call_operand.vmem [shape: f32[1,512], index: 3, kind: input, shape index: {}]   ;;  %s2069_s4 = inlined_call_operand.hbm [shape: f32[1,512], index: 4, kind: input, shape index: {}]   ;;  %s2070_s5 = inlined_call_operand.hbm [shape: s8[512,256], index: 5, kind: input, shape index: {}]   ;;  %s2071_s6 = inlined_call_operand.vmem [shape: f32[1,256], index: 6, kind: input, shape index: {}]   ;;  %s2072_s7 = inlined_call_operand.vmem [shape: f32[1,256], index: 7, kind: input, shape index: {}]   ;;  %s2073_s8 = inlined_call_operand.vmem [shape: f32[1,256], index: 8, kind: input, shape index: {}]   ;;  %s2074_s9 = inlined_call_operand.hbm [shape: bf16[256,128], index: 9, kind: input, shape index: {}]   ;;  %s2075_s10 = inlined_call_operand.vmem [shape: f32[1,128], index: 10, kind: input, shape index: {}]   ;;  %s2076_s11 = inlined_call_operand.hbm [shape: bf16[8,128], index: 11, kind: output, shape index: {}]  }
   0x1   :  { %17 = vsyncpa [#allocation6], 0 }
   0x2   :  { %18 = vsyncpa [#allocation9], 0 }
   0x3   :  { %19 = vsyncpa [#allocation12], 0 }
   0x4   :  { %20 = vsyncpa [#allocation4], 0  ;;  %s1811_s17 = smov [#allocation5]  }
   0x5   :  { %s36_s18 = sshll.u32 %s1811_s17, 4  ;;  %s37_s18 = int_to_ptr.vmem [resolvable:$true] %s36_s18 }
   0x6   :  { %s1669_s19 = scalar_lea.vmem %s37_s18, 16384  ;;  %p1674_p1 = scmp.lt.s32.totalorder %s37_s18, %s37_s18 }
   0x7   :  { %p1670_p0 = scmp.ne.s32.totalorder %s37_s18, %s1669_s19  ;;  %p1675_p2 = scmp.lt.s32.totalorder %s1669_s19, %s1669_s19 }
   0x9   :  { %p1676_p3 = por %p1675_p2, %p1674_p1 }
   0xb   :  { %p1677_p4 = pnand %p1676_p3, %p1670_p0 }
   0xd   :  { %1680 = shalt.err (!%p1677_p4)
}
   0xe   :  { %s1812_s20 = smov 512   ;;  %s1813_s21 = smov 32  }
   0xf   :  { %42 = dma.hbm_to_vmem [thread:$0]  %s2066_s1, 16384, %s37_s18, [#allocation6], %s1812_s20, %s1812_s20, %s1813_s21  }
  0x10   :  { %s1814_s24 = smov [#allocation8]   ;;  %s1815_s26 = smov [#allocation2]  }
  0x11   :  { %s61_s25 = sshll.u32 %s1814_s24, 4  ;;  %s27_s27 = sshll.u32 %s1815_s26, 4  ;;  %s62_s25 = int_to_ptr.vmem [resolvable:$true] %s61_s25  ;;  %s28_s27 = int_to_ptr.vmem [resolvable:$true] %s27_s27 }
  0x12   :  { %s1689_s28 = scalar_lea.vmem %s62_s25, 64  ;;  %p1694_p6 = scmp.lt.s32.totalorder %s62_s25, %s62_s25 }
  0x13   :  { %p1690_p5 = scmp.ne.s32.totalorder %s62_s25, %s1689_s28  ;;  %p1695_p7 = scmp.lt.s32.totalorder %s1689_s28, %s1689_s28 }
  0x15   :  { %p1696_p8 = por %p1695_p7, %p1694_p6 }
  0x17   :  { %p1697_p9 = pnand %p1696_p8, %p1690_p5 }
  0x19   :  { %1700 = shalt.err (!%p1697_p9)
}
  0x1a   :  { %64 = dma.hbm_to_vmem [thread:$0]  %s2069_s4, 64, %s62_s25, [#allocation9]  }
  0x1b   :  { %s1709_s12 = scalar_lea.vmem %s28_s27, 1024  ;;  %p1714_p11 = scmp.lt.s32.totalorder %s28_s27, %s28_s27 }
  0x1c   :  { %p1710_p10 = scmp.ne.s32.totalorder %s28_s27, %s1709_s12  ;;  %p1715_p12 = scmp.lt.s32.totalorder %s1709_s12, %s1709_s12 }
  0x1e   :  { %p1716_p13 = por %p1715_p12, %p1714_p11 }
  0x20   :  { %p1717_p0 = pnand %p1716_p13, %p1710_p10 }
  0x22   :  { %1720 = shalt.err (!%p1717_p0)
}
  0x23   :  { %30 = dma.hbm_to_vmem [thread:$0]  %s2065_s0, 1024, %s28_s27, [#allocation3]  }
  0x24   :  { %s1816_s14 = smov [#allocation7]   ;;  %s1817_s16 = smov [#allocation10]  }
  0x25   :  { %s49_s15 = sshll.u32 %s1816_s14, 4  ;;  %s70_s17 = sshll.u32 %s1817_s16, 4  ;;  %s50_s15 = int_to_ptr.vmem [resolvable:$true] %s49_s15  ;;  %s71_s17 = int_to_ptr.vmem [resolvable:$true] %s70_s17 }
  0x26   :  { %s1729_s18 = scalar_lea.vmem %s50_s15, 64  ;;  %p1734_p2 = scmp.lt.s32.totalorder %s50_s15, %s50_s15 }
  0x27   :  { %p1730_p1 = scmp.ne.s32.totalorder %s50_s15, %s1729_s18  ;;  %p1735_p3 = scmp.lt.s32.totalorder %s1729_s18, %s1729_s18 }
  0x29   :  { %p1736_p4 = por %p1735_p3, %p1734_p2 }
  0x2b   :  { %p1737_p5 = pnand %p1736_p4, %p1730_p1 }
  0x2d   :  { %1740 = shalt.err (!%p1737_p5)
}
  0x2e   :  { %52 = dma.hbm_to_vmem [thread:$0]  %s2067_s2, 64, %s50_s15, [#allocation6]  }
  0x2f   :  { %s1749_s20 = scalar_lea.vmem %s71_s17, 4096  ;;  %p1754_p7 = scmp.lt.s32.totalorder %s71_s17, %s71_s17 }
  0x30   :  { %p1750_p6 = scmp.ne.s32.totalorder %s71_s17, %s1749_s20  ;;  %p1755_p8 = scmp.lt.s32.totalorder %s1749_s20, %s1749_s20 }
  0x32   :  { %p1756_p9 = por %p1755_p8, %p1754_p7 }
  0x34   :  { %p1757_p10 = pnand %p1756_p9, %p1750_p6 }
  0x36   :  { %1760 = shalt.err (!%p1757_p10)
}
  0x37   :  { %s1818_s0 = smov 256   ;;  %s1819_s21 = smov 16  }
  0x38   :  { %76 = dma.hbm_to_vmem [thread:$0]  %s2070_s5, 4096, %s71_s17, [#allocation9], %s1818_s0, %s1818_s0, %s1819_s21  }
  0x39   :  { %s1820_s24 = smov [#allocation11]  }
  0x3a   :  { %s88_s25 = sshll.u32 %s1820_s24, 4  ;;  %s89_s25 = int_to_ptr.vmem [resolvable:$true] %s88_s25 }
  0x3b   :  { %s1769_s26 = scalar_lea.vmem %s89_s25, 2048  ;;  %p1774_p12 = scmp.lt.s32.totalorder %s89_s25, %s89_s25 }
  0x3c   :  { %p1770_p11 = scmp.ne.s32.totalorder %s89_s25, %s1769_s26  ;;  %p1775_p13 = scmp.lt.s32.totalorder %s1769_s26, %s1769_s26 }
  0x3e   :  { %p1776_p0 = por %p1775_p13, %p1774_p12 }
  0x40   :  { %p1777_p1 = pnand %p1776_p0, %p1770_p11 }
  0x42   :  { %1780 = shalt.err (!%p1777_p1)
}
  0x43   :  { %s1821_s2 = smov 64   ;;  %s1822_s27 = smov 4  }
  0x44   :  { %94 = dma.hbm_to_vmem [thread:$0]  %s2074_s9, 2048, %s89_s25, [#allocation12], %s1821_s2, %s1821_s2, %s1822_s27  }
  0x45   :  { %1801 = dma.done.wait [#allocation3], 1024  }
  0x46   :  { %1802 = vsyncadd [#allocation3], 4294966272 }
  0x47   :  { %1803 = dma.done.wait [#allocation6], 16448  }
  0x48   :  { %1804 = vsyncadd [#allocation6], 4294950848 }
  0x49   :  { %1805 = dma.done.wait [#allocation9], 4160  }
  0x4a   :  { %1806 = vsyncadd [#allocation9], 4294963136 }
  0x4b   :  { %1807 = dma.done.wait [#allocation12], 2048  }
  0x4c   :  { %1808 = vsyncadd [#allocation12], 4294965248  ;;  %v145_v0 = vld [vmem:[#allocation5 + $0x68] sm:$0xff]  ;;  %v144_v2 = vld [vmem:[#allocation5 + $0x60] sm:$0xff]  ;;  %s1824_s14 = smov [#allocation13]  }
  0x4d   :  { %v177_v1 = vld [vmem:[#allocation5 + $0x168] sm:$0xff]  ;;  %v285_v3 = vunpack.c.l.s8.bf16 %v145_v0  ;;  %v289_v4 = vunpack.c.h.s8.bf16 %v145_v0  ;;  %v176_v7 = vld [vmem:[#allocation5 + $0x160] sm:$0xff]  ;;  %v288_v8 = vunpack.c.h.s8.bf16 %v144_v2  ;;  %v284_v12 = vunpack.c.l.s8.bf16 %v144_v2  ;;  %v119_v31 = vld [vmem:[#allocation2 + $0x18] sm:$0xff]  ;;  %s1566_s15 = sshll.u32 %s1824_s14, 4  ;;  %s1567_s15 = int_to_ptr.vmem [resolvable:$true] %s1566_s15 }
  0x4e   :  { %v349_v5 = vunpack.c.l.s8.bf16 %v177_v1  ;;  %v353_v6 = vunpack.c.h.s8.bf16 %v177_v1  ;;  %v352_v9 = vunpack.c.h.s8.bf16 %v176_v7  ;;  %v141_v10 = vld [vmem:[#allocation5 + $0x48] sm:$0xff]  ;;  %v348_v13 = vunpack.c.l.s8.bf16 %v176_v7  ;;  %v140_v16 = vld [vmem:[#allocation5 + $0x40] sm:$0xff]  ;;  %s1781_s16 = scalar_lea.vmem %s1567_s15, 64  ;;  %p1786_p3 = scmp.lt.s32.totalorder %s1567_s15, %s1567_s15 }
  0x4f   :  { %v173_v11 = vld [vmem:[#allocation5 + $0x148] sm:$0xff]  ;;  %516 = vmatprep.subr.bf16.mxu0 %v289_v4  ;;  %v281_v14 = vunpack.c.h.s8.bf16 %v141_v10  ;;  %v172_v17 = vld [vmem:[#allocation5 + $0x140] sm:$0xff]  ;;  %v280_v18 = vunpack.c.h.s8.bf16 %v140_v16  ;;  %v277_v20 = vunpack.c.l.s8.bf16 %v141_v10  ;;  %v276_v24 = vunpack.c.l.s8.bf16 %v140_v16  ;;  %p1782_p2 = scmp.ne.s32.totalorder %s1567_s15, %s1781_s16  ;;  %p1787_p4 = scmp.lt.s32.totalorder %s1781_s16, %s1781_s16 }
  0x50   :  { %557 = vmatprep.subr.bf16.mxu1 %v353_v6  ;;  %517 = vmatpush1.bf16.msra.mxu0 %v288_v8  ;;  %v345_v15 = vunpack.c.h.s8.bf16 %v173_v11  ;;  %v344_v19 = vunpack.c.h.s8.bf16 %v172_v17  ;;  %v341_v21 = vunpack.c.l.s8.bf16 %v173_v11  ;;  %v137_v22 = vld [vmem:[#allocation5 + $0x28] sm:$0xff]  ;;  %v340_v25 = vunpack.c.l.s8.bf16 %v172_v17  ;;  %v136_v28 = vld [vmem:[#allocation5 + $0x20] sm:$0xff] }
  0x51   :  { %558 = vmatpush1.bf16.msra.mxu1 %v352_v9  ;;  %518 = vmatprep.subr.bf16.mxu0 %v285_v3  ;;  %v169_v23 = vld [vmem:[#allocation5 + $0x128] sm:$0xff]  ;;  %v273_v26 = vunpack.c.h.s8.bf16 %v137_v22  ;;  %v168_v29 = vld [vmem:[#allocation5 + $0x120] sm:$0xff]  ;;  %v272_v32 = vunpack.c.h.s8.bf16 %v136_v28  ;;  %v269_v34 = vunpack.c.l.s8.bf16 %v137_v22  ;;  %v1905_v37 = vpack.c.bf16 %v119_v31, %v119_v31  ;;  %p1788_p5 = por %p1787_p4, %p1786_p3 }
  0x52   :  { %559 = vmatprep.subr.bf16.mxu1 %v349_v5  ;;  %v337_v27 = vunpack.c.h.s8.bf16 %v169_v23  ;;  %v117_v30 = vld [vmem:[#allocation2 + $0x8] sm:$0xff]  ;;  %v336_v33 = vunpack.c.h.s8.bf16 %v168_v29  ;;  %v333_v35 = vunpack.c.l.s8.bf16 %v169_v23  ;;  %v268_v40 = vunpack.c.l.s8.bf16 %v136_v28  ;;  %v132_v44 = vld [vmem:[#allocation5] sm:$0xff] }
  0x53   :  { %v1903_v36 = vpack.c.bf16 %v117_v30, %v117_v30  ;;  %v133_v38 = vld [vmem:[#allocation5 + $0x8] sm:$0xff]  ;;  %589 = vmatprep.mubr.bf16.mxu1 %v1905_v37  ;;  %v332_v41 = vunpack.c.l.s8.bf16 %v168_v29  ;;  %v164_v45 = vld [vmem:[#allocation5 + $0x100] sm:$0xff]  ;;  %v264_v46 = vunpack.c.h.s8.bf16 %v132_v44  ;;  %v260_v52 = vunpack.c.l.s8.bf16 %v132_v44  ;;  %p1789_p6 = pnand %p1788_p5, %p1782_p2 }
  0x54   :  { %519 = vmatpush1.bf16.msra.mxu0 %v284_v12  ;;  %v165_v39 = vld [vmem:[#allocation5 + $0x108] sm:$0xff]  ;;  %v265_v42 = vunpack.c.h.s8.bf16 %v133_v38  ;;  %v328_v47 = vunpack.c.h.s8.bf16 %v164_v45  ;;  %v261_v48 = vunpack.c.l.s8.bf16 %v133_v38  ;;  %v324_v53 = vunpack.c.l.s8.bf16 %v164_v45  ;;  %v160_v54 = vld [vmem:[#allocation5 + $0xe0] sm:$0xff] }
  0x55   :  { %560 = vmatpush1.bf16.msra.mxu1 %v348_v13  ;;  %520 = vmatprep.subr.bf16.mxu0 %v281_v14  ;;  %v329_v43 = vunpack.c.h.s8.bf16 %v165_v39  ;;  %v325_v49 = vunpack.c.l.s8.bf16 %v165_v39  ;;  %v161_v50 = vld [vmem:[#allocation5 + $0xe8] sm:$0xff]  ;;  %v192_v57 = vld [vmem:[#allocation5 + $0x1e0] sm:$0xff]  ;;  %v320_v58 = vunpack.c.h.s8.bf16 %v160_v54  ;;  %v316_v2 = vunpack.c.l.s8.bf16 %v160_v54 }
  0x56   :  { %561 = vmatprep.subr.bf16.mxu1 %v345_v15  ;;  %548 = vmatprep.mubr.bf16.mxu0 %v1903_v36  ;;  %v193_v51 = vld [vmem:[#allocation5 + $0x1e8] sm:$0xff]  ;;  %v321_v55 = vunpack.c.h.s8.bf16 %v161_v50  ;;  %v384_v59 = vunpack.c.h.s8.bf16 %v192_v57  ;;  %v317_v60 = vunpack.c.l.s8.bf16 %v161_v50  ;;  %v156_v0 = vld [vmem:[#allocation5 + $0xc0] sm:$0xff]  ;;  %v380_v3 = vunpack.c.l.s8.bf16 %v192_v57 }
  0x57   :  { %v385_v56 = vunpack.c.h.s8.bf16 %v193_v51  ;;  %v381_v61 = vunpack.c.l.s8.bf16 %v193_v51  ;;  %v157_v62 = vld [vmem:[#allocation5 + $0xc8] sm:$0xff]  ;;  %v188_v1 = vld [vmem:[#allocation5 + $0x1c0] sm:$0xff]  ;;  %v312_v6 = vunpack.c.h.s8.bf16 %v156_v0  ;;  %v308_v12 = vunpack.c.l.s8.bf16 %v156_v0 }
  0x58   :  { %521 = vmatpush1.bf16.msra.mxu0 %v280_v18  ;;  %v189_v63 = vld [vmem:[#allocation5 + $0x1c8] sm:$0xff]  ;;  %v313_v4 = vunpack.c.h.s8.bf16 %v157_v62  ;;  %v376_v7 = vunpack.c.h.s8.bf16 %v188_v1  ;;  %v309_v8 = vunpack.c.l.s8.bf16 %v157_v62  ;;  %v372_v13 = vunpack.c.l.s8.bf16 %v188_v1  ;;  %v152_v16 = vld [vmem:[#allocation5 + $0xa0] sm:$0xff] }
  0x59   :  { %562 = vmatpush1.bf16.msra.mxu1 %v344_v19  ;;  %522 = vmatprep.subr.bf16.mxu0 %v277_v20  ;;  %v377_v5 = vunpack.c.h.s8.bf16 %v189_v63  ;;  %v373_v9 = vunpack.c.l.s8.bf16 %v189_v63  ;;  %v153_v10 = vld [vmem:[#allocation5 + $0xa8] sm:$0xff]  ;;  %v184_v17 = vld [vmem:[#allocation5 + $0x1a0] sm:$0xff]  ;;  %v304_v18 = vunpack.c.h.s8.bf16 %v152_v16 }
  0x5a   :  { %563 = vmatprep.subr.bf16.mxu1 %v341_v21  ;;  %v185_v11 = vld [vmem:[#allocation5 + $0x1a8] sm:$0xff]  ;;  %v305_v14 = vunpack.c.h.s8.bf16 %v153_v10  ;;  %v368_v19 = vunpack.c.h.s8.bf16 %v184_v17  ;;  %v301_v20 = vunpack.c.l.s8.bf16 %v153_v10  ;;  %v148_v28 = vld [vmem:[#allocation5 + $0x80] sm:$0xff] }
  0x5b   :  { %v369_v15 = vunpack.c.h.s8.bf16 %v185_v11  ;;  %v365_v21 = vunpack.c.l.s8.bf16 %v185_v11  ;;  %v149_v22 = vld [vmem:[#allocation5 + $0x88] sm:$0xff]  ;;  %v180_v29 = vld [vmem:[#allocation5 + $0x180] sm:$0xff]  ;;  %v296_v30 = vunpack.c.h.s8.bf16 %v148_v28  ;;  %v292_v38 = vunpack.c.l.s8.bf16 %v148_v28 }
  0x5c   :  { %523 = vmatpush1.bf16.msra.mxu0 %v276_v24  ;;  %v181_v23 = vld [vmem:[#allocation5 + $0x188] sm:$0xff]  ;;  %v300_v24 = vunpack.c.l.s8.bf16 %v152_v16  ;;  %v360_v31 = vunpack.c.h.s8.bf16 %v180_v29  ;;  %v356_v39 = vunpack.c.l.s8.bf16 %v180_v29  ;;  %v208_v44 = vld [vmem:[#allocation5 + $0x260] sm:$0xff] }
  0x5d   :  { %564 = vmatpush1.bf16.msra.mxu1 %v340_v25  ;;  %524 = vmatprep.subr.bf16.mxu0 %v273_v26  ;;  %v364_v25 = vunpack.c.l.s8.bf16 %v184_v17  ;;  %v297_v26 = vunpack.c.h.s8.bf16 %v149_v22  ;;  %v240_v45 = vld [vmem:[#allocation5 + $0x360] sm:$0xff]  ;;  %v416_v50 = vunpack.c.h.s8.bf16 %v208_v44  ;;  %v205_v54 = vld [vmem:[#allocation5 + $0x248] sm:$0xff] }
  0x5e   :  { %565 = vmatprep.subr.bf16.mxu1 %v337_v27  ;;  %v361_v27 = vunpack.c.h.s8.bf16 %v181_v23  ;;  %v480_v51 = vunpack.c.h.s8.bf16 %v240_v45  ;;  %v204_v62 = vld [vmem:[#allocation5 + $0x240] sm:$0xff]  ;;  %v197_v16 = vld [vmem:[#allocation5 + $0x208] sm:$0xff] }
  0x5f   :  { %v236_v63 = vld [vmem:[#allocation5 + $0x340] sm:$0xff]  ;;  %v408_v0 = vunpack.c.h.s8.bf16 %v204_v62  ;;  %v229_v17 = vld [vmem:[#allocation5 + $0x308] sm:$0xff] }
  0x60   :  { %525 = vmatpush1.bf16.msra.mxu0 %v272_v32  ;;  %v293_v32 = vunpack.c.l.s8.bf16 %v149_v22  ;;  %v472_v1 = vunpack.c.h.s8.bf16 %v236_v63  ;;  %v200_v10 = vld [vmem:[#allocation5 + $0x220] sm:$0xff]  ;;  %v225_v28 = vld [vmem:[#allocation5 + $0x2e8] sm:$0xff] }
  0x61   :  { %566 = vmatpush1.bf16.msra.mxu1 %v336_v33  ;;  %526 = vmatprep.subr.bf16.mxu0 %v269_v34  ;;  %v357_v33 = vunpack.c.l.s8.bf16 %v181_v23  ;;  %v209_v34 = vld [vmem:[#allocation5 + $0x268] sm:$0xff]  ;;  %v232_v11 = vld [vmem:[#allocation5 + $0x320] sm:$0xff] }
  0x62   :  { %567 = vmatprep.subr.bf16.mxu1 %v333_v35  ;;  %v241_v35 = vld [vmem:[#allocation5 + $0x368] sm:$0xff]  ;;  %v196_v22 = vld [vmem:[#allocation5 + $0x200] sm:$0xff] }
  0x63   :  { %v228_v23 = vld [vmem:[#allocation5 + $0x300] sm:$0xff]  ;;  %v257_v29 = vld [vmem:[#allocation5 + $0x3e8] sm:$0xff] }
  0x64   :  { %527 = vmatpush1.bf16.msra.mxu0 %v268_v40  ;;  %v116_v40 = vld [vmem:[#allocation2] sm:$0xff] }
  0x65   :  { %568 = vmatpush1.bf16.msra.mxu1 %v332_v41  ;;  %528 = vmatprep.subr.bf16.mxu0 %v265_v42  ;;  %v118_v41 = vld [vmem:[#allocation2 + $0x10] sm:$0xff]  ;;  %v417_v42 = vunpack.c.h.s8.bf16 %v209_v34 }
  0x66   :  { %569 = vmatprep.subr.bf16.mxu1 %v329_v43  ;;  %v481_v43 = vunpack.c.h.s8.bf16 %v241_v35 }
  0x68   :  { %529 = vmatpush1.bf16.msra.mxu0 %v264_v46  ;;  %v1909_v46 = vpack.c.bf16 %v116_v40, %v116_v40  ;;  %v445_v40 = vunpack.c.l.s8.bf16 %v225_v28 }
  0x69   :  { %570 = vmatpush1.bf16.msra.mxu1 %v328_v47  ;;  %530 = vmatprep.subr.bf16.mxu0 %v261_v48  ;;  %v1911_v47 = vpack.c.bf16 %v118_v41, %v118_v41  ;;  %v121_v48 = vld [vmem:[#allocation2 + $0x28] sm:$0xff]  ;;  %v509_v41 = vunpack.c.l.s8.bf16 %v257_v29 }
  0x6a   :  { %571 = vmatprep.subr.bf16.mxu1 %v325_v49  ;;  %v123_v49 = vld [vmem:[#allocation2 + $0x38] sm:$0xff] }
  0x6b   :  { %v1915_v57 = vpack.c.bf16 %v123_v49, %v123_v49 }
  0x6c   :  { %531 = vmatpush1.bf16.msra.mxu0 %v260_v52  ;;  %v413_v52 = vunpack.c.l.s8.bf16 %v209_v34  ;;  %v224_v34 = vld [vmem:[#allocation5 + $0x2e0] sm:$0xff] }
  0x6d   :  { %572 = vmatpush1.bf16.msra.mxu1 %v324_v53  ;;  %532 = vmatprep.subr.bf16.mxu0 %v321_v55  ;;  %v477_v53 = vunpack.c.l.s8.bf16 %v241_v35  ;;  %v237_v55 = vld [vmem:[#allocation5 + $0x348] sm:$0xff]  ;;  %v256_v35 = vld [vmem:[#allocation5 + $0x3e0] sm:$0xff] }
  0x6e   :  { %573 = vmatprep.subr.bf16.mxu1 %v385_v56  ;;  %v1913_v56 = vpack.c.bf16 %v121_v48, %v121_v48 }
  0x70   :  { %533 = vmatpush2.bf16.msra.mxu0 %v320_v58  ;;  %v412_v58 = vunpack.c.l.s8.bf16 %v208_v44  ;;  %v444_v44 = vunpack.c.l.s8.bf16 %v224_v34 }
  0x71   :  { %574 = vmatpush2.bf16.msra.mxu1 %v384_v59  ;;  %534 = vmatprep.subr.bf16.mxu0 %v317_v60  ;;  %v476_v59 = vunpack.c.l.s8.bf16 %v240_v45  ;;  %v409_v60 = vunpack.c.h.s8.bf16 %v205_v54  ;;  %v508_v45 = vunpack.c.l.s8.bf16 %v256_v35 }
  0x72   :  { %575 = vmatprep.subr.bf16.mxu1 %v381_v61  ;;  %v473_v61 = vunpack.c.h.s8.bf16 %v237_v55 }
  0x74   :  { %535 = vmatpush2.bf16.msra.mxu0 %v316_v2  ;;  %v405_v2 = vunpack.c.l.s8.bf16 %v205_v54 }
  0x75   :  { %576 = vmatpush2.bf16.msra.mxu1 %v380_v3  ;;  %536 = vmatprep.subr.bf16.mxu0 %v313_v4  ;;  %v469_v3 = vunpack.c.l.s8.bf16 %v237_v55  ;;  %v201_v4 = vld [vmem:[#allocation5 + $0x228] sm:$0xff] }
  0x76   :  { %577 = vmatprep.subr.bf16.mxu1 %v377_v5  ;;  %v233_v5 = vld [vmem:[#allocation5 + $0x328] sm:$0xff] }
  0x78   :  { %537 = vmatpush2.bf16.msra.mxu0 %v312_v6  ;;  %v404_v6 = vunpack.c.l.s8.bf16 %v204_v62 }
  0x79   :  { %578 = vmatpush2.bf16.msra.mxu1 %v376_v7  ;;  %538 = vmatprep.subr.bf16.mxu0 %v309_v8  ;;  %v468_v7 = vunpack.c.l.s8.bf16 %v236_v63  ;;  %v401_v8 = vunpack.c.h.s8.bf16 %v201_v4 }
  0x7a   :  { %579 = vmatprep.subr.bf16.mxu1 %v373_v9  ;;  %v465_v9 = vunpack.c.h.s8.bf16 %v233_v5 }
  0x7c   :  { %539 = vmatpush2.bf16.msra.mxu0 %v308_v12  ;;  %v400_v12 = vunpack.c.h.s8.bf16 %v200_v10 }
  0x7d   :  { %580 = vmatpush2.bf16.msra.mxu1 %v372_v13  ;;  %540 = vmatprep.subr.bf16.mxu0 %v305_v14  ;;  %v464_v13 = vunpack.c.h.s8.bf16 %v232_v11  ;;  %v397_v14 = vunpack.c.l.s8.bf16 %v201_v4 }
  0x7e   :  { %581 = vmatprep.subr.bf16.mxu1 %v369_v15  ;;  %v461_v15 = vunpack.c.l.s8.bf16 %v233_v5 }
  0x80   :  { %541 = vmatpush2.bf16.msra.mxu0 %v304_v18  ;;  %v396_v18 = vunpack.c.l.s8.bf16 %v200_v10 }
  0x81   :  { %582 = vmatpush2.bf16.msra.mxu1 %v368_v19  ;;  %542 = vmatprep.subr.bf16.mxu0 %v301_v20  ;;  %v460_v19 = vunpack.c.l.s8.bf16 %v232_v11  ;;  %v393_v20 = vunpack.c.h.s8.bf16 %v197_v16 }
  0x82   :  { %583 = vmatprep.subr.bf16.mxu1 %v365_v21  ;;  %v457_v21 = vunpack.c.h.s8.bf16 %v229_v17 }
  0x84   :  { %543 = vmatpush2.bf16.msra.mxu0 %v300_v24  ;;  %v392_v24 = vunpack.c.h.s8.bf16 %v196_v22 }
  0x85   :  { %584 = vmatpush2.bf16.msra.mxu1 %v364_v25  ;;  %544 = vmatprep.subr.bf16.mxu0 %v297_v26  ;;  %v456_v25 = vunpack.c.h.s8.bf16 %v228_v23  ;;  %v389_v26 = vunpack.c.l.s8.bf16 %v197_v16 }
  0x86   :  { %585 = vmatprep.subr.bf16.mxu1 %v361_v27  ;;  %v453_v27 = vunpack.c.l.s8.bf16 %v229_v17 }
  0x88   :  { %545 = vmatpush2.bf16.msra.mxu0 %v296_v30  ;;  %v388_v30 = vunpack.c.l.s8.bf16 %v196_v22  ;;  %v120_v22 = vld [vmem:[#allocation2 + $0x20] sm:$0xff] }
  0x89   :  { %586 = vmatpush2.bf16.msra.mxu1 %v360_v31  ;;  %546 = vmatprep.subr.bf16.mxu0 %v293_v32  ;;  %v452_v31 = vunpack.c.l.s8.bf16 %v228_v23  ;;  %v449_v32 = vunpack.c.h.s8.bf16 %v225_v28  ;;  %v122_v23 = vld [vmem:[#allocation2 + $0x30] sm:$0xff]  ;;  %v1921_v28 = vpack.c.bf16 %v120_v22, %v120_v22  ;;  %v159_v22 = vld [vmem:[#allocation5 + $0xd8] sm:$0xff] }
  0x8a   :  { %587 = vmatprep.subr.bf16.mxu1 %v357_v33  ;;  %v513_v33 = vunpack.c.h.s8.bf16 %v257_v29  ;;  %v1923_v29 = vpack.c.bf16 %v122_v23, %v122_v23  ;;  %v191_v23 = vld [vmem:[#allocation5 + $0x1d8] sm:$0xff] }
  0x8c   :  { %547 = vmatpush2.bf16.msra.mxu0 %v292_v38  ;;  %v448_v38 = vunpack.c.h.s8.bf16 %v224_v34  ;;  %v143_v34 = vld [vmem:[#allocation5 + $0x58] sm:$0xff] }
  0x8d   :  { %588 = vmatpush2.bf16.msra.mxu1 %v356_v39  ;;  %598 = vmatprep.subr.bf16.mxu0 %v417_v42  ;;  %v512_v39 = vunpack.c.h.s8.bf16 %v256_v35  ;;  %v221_v42 = vld [vmem:[#allocation5 + $0x2c8] sm:$0xff]  ;;  %v175_v35 = vld [vmem:[#allocation5 + $0x158] sm:$0xff] }
  0x8e   :  { %639 = vmatprep.subr.bf16.mxu1 %v481_v43  ;;  %v253_v43 = vld [vmem:[#allocation5 + $0x3c8] sm:$0xff]  ;;  %v441_v48 = vunpack.c.h.s8.bf16 %v221_v42  ;;  %v437_v54 = vunpack.c.l.s8.bf16 %v221_v42  ;;  %v142_v42 = vld [vmem:[#allocation5 + $0x50] sm:$0xff] }
  0x8f   :  { %549 = vmatmul.mubr.bf16.vlgmr.msra.gmra.mxu0 %v1909_v46  ;;  %v505_v49 = vunpack.c.h.s8.bf16 %v253_v43  ;;  %v501_v55 = vunpack.c.l.s8.bf16 %v253_v43  ;;  %v174_v43 = vld [vmem:[#allocation5 + $0x150] sm:$0xff] }
  0x90   :  { %590 = vmatmul.mubr.bf16.vlgmr.msra.gmra.mxu1 %v1911_v47  ;;  %599 = vmatpush1.bf16.msra.mxu0 %v416_v50  ;;  %v220_v50 = vld [vmem:[#allocation5 + $0x2c0] sm:$0xff] }
  0x91   :  { %640 = vmatpush1.bf16.msra.mxu1 %v480_v51  ;;  %600 = vmatprep.subr.bf16.mxu0 %v413_v52  ;;  %v252_v51 = vld [vmem:[#allocation5 + $0x3c0] sm:$0xff]  ;;  %v440_v52 = vunpack.c.h.s8.bf16 %v220_v50 }
  0x92   :  { %641 = vmatprep.subr.bf16.mxu1 %v477_v53  ;;  %630 = vmatprep.mubr.bf16.mxu0 %v1913_v56  ;;  %v504_v53 = vunpack.c.h.s8.bf16 %v252_v51 }
  0x93   :  { %671 = vmatprep.mubr.bf16.mxu1 %v1915_v57 }
  0x94   :  { %601 = vmatpush1.bf16.msra.mxu0 %v412_v58  ;;  %v217_v58 = vld [vmem:[#allocation5 + $0x2a8] sm:$0xff] }
  0x95   :  { %642 = vmatpush1.bf16.msra.mxu1 %v476_v59  ;;  %602 = vmatprep.subr.bf16.mxu0 %v409_v60  ;;  %v249_v59 = vld [vmem:[#allocation5 + $0x3a8] sm:$0xff]  ;;  %v436_v60 = vunpack.c.l.s8.bf16 %v220_v50  ;;  %v433_v62 = vunpack.c.h.s8.bf16 %v217_v58  ;;  %v429_v4 = vunpack.c.l.s8.bf16 %v217_v58  ;;  %v139_v50 = vld [vmem:[#allocation5 + $0x38] sm:$0xff] }
  0x96   :  { %643 = vmatprep.subr.bf16.mxu1 %v473_v61  ;;  %v500_v61 = vunpack.c.l.s8.bf16 %v252_v51  ;;  %v497_v63 = vunpack.c.h.s8.bf16 %v249_v59  ;;  %v493_v5 = vunpack.c.l.s8.bf16 %v249_v59  ;;  %v171_v51 = vld [vmem:[#allocation5 + $0x138] sm:$0xff] }
  0x98   :  { %603 = vmatpush1.bf16.msra.mxu0 %v408_v0  ;;  %v216_v0 = vld [vmem:[#allocation5 + $0x2a0] sm:$0xff] }
  0x99   :  { %644 = vmatpush1.bf16.msra.mxu1 %v472_v1  ;;  %604 = vmatprep.subr.bf16.mxu0 %v405_v2  ;;  %v248_v1 = vld [vmem:[#allocation5 + $0x3a0] sm:$0xff]  ;;  %v432_v2 = vunpack.c.h.s8.bf16 %v216_v0 }
  0x9a   :  { %645 = vmatprep.subr.bf16.mxu1 %v469_v3  ;;  %v496_v3 = vunpack.c.h.s8.bf16 %v248_v1 }
  0x9c   :  { %605 = vmatpush1.bf16.msra.mxu0 %v404_v6  ;;  %v213_v6 = vld [vmem:[#allocation5 + $0x288] sm:$0xff] }
  0x9d   :  { %646 = vmatpush1.bf16.msra.mxu1 %v468_v7  ;;  %606 = vmatprep.subr.bf16.mxu0 %v401_v8  ;;  %v245_v7 = vld [vmem:[#allocation5 + $0x388] sm:$0xff]  ;;  %v428_v8 = vunpack.c.l.s8.bf16 %v216_v0  ;;  %v425_v10 = vunpack.c.h.s8.bf16 %v213_v6  ;;  %v421_v16 = vunpack.c.l.s8.bf16 %v213_v6 }
  0x9e   :  { %647 = vmatprep.subr.bf16.mxu1 %v465_v9  ;;  %v492_v9 = vunpack.c.l.s8.bf16 %v248_v1  ;;  %v489_v11 = vunpack.c.h.s8.bf16 %v245_v7  ;;  %v485_v17 = vunpack.c.l.s8.bf16 %v245_v7 }
  0xa0   :  { %607 = vmatpush1.bf16.msra.mxu0 %v400_v12  ;;  %v212_v12 = vld [vmem:[#allocation5 + $0x280] sm:$0xff] }
  0xa1   :  { %648 = vmatpush1.bf16.msra.mxu1 %v464_v13  ;;  %608 = vmatprep.subr.bf16.mxu0 %v397_v14  ;;  %v244_v13 = vld [vmem:[#allocation5 + $0x380] sm:$0xff]  ;;  %v424_v14 = vunpack.c.h.s8.bf16 %v212_v12 }
  0xa2   :  { %649 = vmatprep.subr.bf16.mxu1 %v461_v15  ;;  %v488_v15 = vunpack.c.h.s8.bf16 %v244_v13 }
  0xa4   :  { %609 = vmatpush1.bf16.msra.mxu0 %v396_v18  ;;  %v147_v18 = vld [vmem:[#allocation5 + $0x78] sm:$0xff] }
  0xa5   :  { %650 = vmatpush1.bf16.msra.mxu1 %v460_v19  ;;  %610 = vmatprep.subr.bf16.mxu0 %v393_v20  ;;  %v179_v19 = vld [vmem:[#allocation5 + $0x178] sm:$0xff]  ;;  %v420_v20 = vunpack.c.l.s8.bf16 %v212_v12 }
  0xa6   :  { %651 = vmatprep.subr.bf16.mxu1 %v457_v21  ;;  %v484_v21 = vunpack.c.l.s8.bf16 %v244_v13 }
  0xa8   :  { %611 = vmatpush1.bf16.msra.mxu0 %v392_v24  ;;  %v291_v24 = vunpack.c.h.s8.bf16 %v147_v18 }
  0xa9   :  { %652 = vmatpush1.bf16.msra.mxu1 %v456_v25  ;;  %612 = vmatprep.subr.bf16.mxu0 %v389_v26  ;;  %v355_v25 = vunpack.c.h.s8.bf16 %v179_v19  ;;  %v146_v26 = vld [vmem:[#allocation5 + $0x70] sm:$0xff] }
  0xaa   :  { %653 = vmatprep.subr.bf16.mxu1 %v453_v27  ;;  %v178_v27 = vld [vmem:[#allocation5 + $0x170] sm:$0xff] }
  0xac   :  { %613 = vmatpush1.bf16.msra.mxu0 %v388_v30  ;;  %v290_v30 = vunpack.c.h.s8.bf16 %v146_v26 }
  0xad   :  { %654 = vmatpush1.bf16.msra.mxu1 %v452_v31  ;;  %614 = vmatprep.subr.bf16.mxu0 %v449_v32  ;;  %v354_v31 = vunpack.c.h.s8.bf16 %v178_v27  ;;  %v287_v32 = vunpack.c.l.s8.bf16 %v147_v18 }
  0xae   :  { %655 = vmatprep.subr.bf16.mxu1 %v513_v33  ;;  %v351_v33 = vunpack.c.l.s8.bf16 %v179_v19 }
  0xb0   :  { %615 = vmatpush2.bf16.msra.mxu0 %v448_v38  ;;  %v286_v38 = vunpack.c.l.s8.bf16 %v146_v26  ;;  %v315_v26 = vunpack.c.h.s8.bf16 %v159_v22 }
  0xb1   :  { %656 = vmatpush2.bf16.msra.mxu1 %v512_v39  ;;  %616 = vmatprep.subr.bf16.mxu0 %v445_v40  ;;  %v350_v39 = vunpack.c.l.s8.bf16 %v178_v27  ;;  %v283_v40 = vunpack.c.h.s8.bf16 %v143_v34  ;;  %v379_v27 = vunpack.c.h.s8.bf16 %v191_v23 }
  0xb2   :  { %657 = vmatprep.subr.bf16.mxu1 %v509_v41  ;;  %v347_v41 = vunpack.c.h.s8.bf16 %v175_v35 }
  0xb4   :  { %617 = vmatpush2.bf16.msra.mxu0 %v444_v44  ;;  %v282_v44 = vunpack.c.h.s8.bf16 %v142_v42 }
  0xb5   :  { %658 = vmatpush2.bf16.msra.mxu1 %v508_v45  ;;  %618 = vmatprep.subr.bf16.mxu0 %v441_v48  ;;  %v346_v45 = vunpack.c.h.s8.bf16 %v174_v43  ;;  %v279_v48 = vunpack.c.l.s8.bf16 %v143_v34  ;;  %v311_v34 = vunpack.c.l.s8.bf16 %v159_v22  ;;  %v203_v22 = vld [vmem:[#allocation5 + $0x238] sm:$0xff] }
  0xb6   :  { %659 = vmatprep.subr.bf16.mxu1 %v505_v49  ;;  %v343_v49 = vunpack.c.l.s8.bf16 %v175_v35  ;;  %v375_v35 = vunpack.c.l.s8.bf16 %v191_v23  ;;  %v235_v23 = vld [vmem:[#allocation5 + $0x338] sm:$0xff] }
  0xb8   :  { %619 = vmatpush2.bf16.msra.mxu0 %v440_v52  ;;  %v278_v52 = vunpack.c.l.s8.bf16 %v142_v42 }
  0xb9   :  { %660 = vmatpush2.bf16.msra.mxu1 %v504_v53  ;;  %620 = vmatprep.subr.bf16.mxu0 %v437_v54  ;;  %v342_v53 = vunpack.c.l.s8.bf16 %v174_v43  ;;  %v275_v54 = vunpack.c.h.s8.bf16 %v139_v50 }
  0xba   :  { %661 = vmatprep.subr.bf16.mxu1 %v501_v55  ;;  %v138_v55 = vld [vmem:[#allocation5 + $0x30] sm:$0xff] }
  0xbb   :  { %v274_v58 = vunpack.c.h.s8.bf16 %v138_v55  ;;  %v270_v0 = vunpack.c.l.s8.bf16 %v138_v55 }
  0xbc   :  { %621 = vmatpush2.bf16.msra.mxu0 %v436_v60  ;;  %v271_v60 = vunpack.c.l.s8.bf16 %v139_v50 }
  0xbd   :  { %662 = vmatpush2.bf16.msra.mxu1 %v500_v61  ;;  %622 = vmatprep.subr.bf16.mxu0 %v433_v62  ;;  %v335_v61 = vunpack.c.l.s8.bf16 %v171_v51  ;;  %v135_v62 = vld [vmem:[#allocation5 + $0x18] sm:$0xff] }
  0xbe   :  { %663 = vmatprep.subr.bf16.mxu1 %v497_v63  ;;  %v167_v63 = vld [vmem:[#allocation5 + $0x118] sm:$0xff] }
  0xc0   :  { %623 = vmatpush2.bf16.msra.mxu0 %v432_v2  ;;  %v267_v2 = vunpack.c.h.s8.bf16 %v135_v62 }
  0xc1   :  { %664 = vmatpush2.bf16.msra.mxu1 %v496_v3  ;;  %624 = vmatprep.subr.bf16.mxu0 %v429_v4  ;;  %v331_v3 = vunpack.c.h.s8.bf16 %v167_v63  ;;  %v134_v4 = vld [vmem:[#allocation5 + $0x10] sm:$0xff] }
  0xc2   :  { %665 = vmatprep.subr.bf16.mxu1 %v493_v5  ;;  %v166_v5 = vld [vmem:[#allocation5 + $0x110] sm:$0xff]  ;;  %v266_v6 = vunpack.c.h.s8.bf16 %v134_v4  ;;  %v262_v12 = vunpack.c.l.s8.bf16 %v134_v4 }
  0xc3   :  { %v330_v7 = vunpack.c.h.s8.bf16 %v166_v5  ;;  %v326_v13 = vunpack.c.l.s8.bf16 %v166_v5 }
  0xc4   :  { %625 = vmatpush2.bf16.msra.mxu0 %v428_v8  ;;  %v263_v8 = vunpack.c.l.s8.bf16 %v135_v62 }
  0xc5   :  { %666 = vmatpush2.bf16.msra.mxu1 %v492_v9  ;;  %626 = vmatprep.subr.bf16.mxu0 %v425_v10  ;;  %v327_v9 = vunpack.c.l.s8.bf16 %v167_v63  ;;  %v163_v10 = vld [vmem:[#allocation5 + $0xf8] sm:$0xff] }
  0xc6   :  { %667 = vmatprep.subr.bf16.mxu1 %v489_v11  ;;  %v195_v11 = vld [vmem:[#allocation5 + $0x1f8] sm:$0xff] }
  0xc8   :  { %627 = vmatpush2.bf16.msra.mxu0 %v424_v14  ;;  %v323_v14 = vunpack.c.h.s8.bf16 %v163_v10 }
  0xc9   :  { %668 = vmatpush2.bf16.msra.mxu1 %v488_v15  ;;  %628 = vmatprep.subr.bf16.mxu0 %v421_v16  ;;  %v387_v15 = vunpack.c.h.s8.bf16 %v195_v11  ;;  %v162_v16 = vld [vmem:[#allocation5 + $0xf0] sm:$0xff] }
  0xca   :  { %669 = vmatprep.subr.bf16.mxu1 %v485_v17  ;;  %v194_v17 = vld [vmem:[#allocation5 + $0x1f0] sm:$0xff]  ;;  %v322_v18 = vunpack.c.h.s8.bf16 %v162_v16 }
  0xcb   :  { %v386_v19 = vunpack.c.h.s8.bf16 %v194_v17 }
  0xcc   :  { %629 = vmatpush2.bf16.msra.mxu0 %v420_v20  ;;  %v319_v20 = vunpack.c.l.s8.bf16 %v163_v10 }
  0xcd   :  { %670 = vmatpush2.bf16.msra.mxu1 %v484_v21  ;;  %680 = vmatprep.subr.bf16.mxu0 %v291_v24  ;;  %v383_v21 = vunpack.c.l.s8.bf16 %v195_v11  ;;  %v318_v24 = vunpack.c.l.s8.bf16 %v162_v16 }
  0xce   :  { %721 = vmatprep.subr.bf16.mxu1 %v355_v25  ;;  %v382_v25 = vunpack.c.l.s8.bf16 %v194_v17 }
  0xcf   :  { %631 = vmatmul.mubr.bf16.vlgmr.msra.gmra.mxu0 %v1921_v28 }
  0xd0   :  { %672 = vmatmul.mubr.bf16.vlgmr.msra.gmra.mxu1 %v1923_v29  ;;  %681 = vmatpush1.bf16.msra.mxu0 %v290_v30  ;;  %v158_v30 = vld [vmem:[#allocation5 + $0xd0] sm:$0xff] }
  0xd1   :  { %722 = vmatpush1.bf16.msra.mxu1 %v354_v31  ;;  %682 = vmatprep.subr.bf16.mxu0 %v287_v32  ;;  %v190_v31 = vld [vmem:[#allocation5 + $0x1d0] sm:$0xff]  ;;  %v314_v32 = vunpack.c.h.s8.bf16 %v158_v30 }
  0xd2   :  { %723 = vmatprep.subr.bf16.mxu1 %v351_v33  ;;  %712 = vmatprep.mubr.bf16.mxu0 %v1903_v36  ;;  %v339_v36 = vunpack.c.h.s8.bf16 %v171_v51  ;;  %v378_v33 = vunpack.c.h.s8.bf16 %v190_v31 }
  0xd3   :  { %753 = vmatprep.mubr.bf16.mxu1 %v1905_v37  ;;  %v170_v37 = vld [vmem:[#allocation5 + $0x130] sm:$0xff] }
  0xd4   :  { %683 = vmatpush1.bf16.msra.mxu0 %v286_v38  ;;  %v338_v59 = vunpack.c.h.s8.bf16 %v170_v37  ;;  %v334_v1 = vunpack.c.l.s8.bf16 %v170_v37  ;;  %v155_v38 = vld [vmem:[#allocation5 + $0xb8] sm:$0xff] }
  0xd5   :  { %724 = vmatpush1.bf16.msra.mxu1 %v350_v39  ;;  %684 = vmatprep.subr.bf16.mxu0 %v283_v40  ;;  %v187_v39 = vld [vmem:[#allocation5 + $0x1b8] sm:$0xff]  ;;  %v310_v40 = vunpack.c.l.s8.bf16 %v158_v30  ;;  %v307_v42 = vunpack.c.h.s8.bf16 %v155_v38  ;;  %v303_v50 = vunpack.c.l.s8.bf16 %v155_v38 }
  0xd6   :  { %725 = vmatprep.subr.bf16.mxu1 %v347_v41  ;;  %v374_v41 = vunpack.c.l.s8.bf16 %v190_v31  ;;  %v371_v43 = vunpack.c.h.s8.bf16 %v187_v39  ;;  %v367_v51 = vunpack.c.l.s8.bf16 %v187_v39 }
  0xd8   :  { %685 = vmatpush1.bf16.msra.mxu0 %v282_v44  ;;  %v154_v44 = vld [vmem:[#allocation5 + $0xb0] sm:$0xff] }
  0xd9   :  { %726 = vmatpush1.bf16.msra.mxu1 %v346_v45  ;;  %686 = vmatprep.subr.bf16.mxu0 %v279_v48  ;;  %v186_v45 = vld [vmem:[#allocation5 + $0x1b0] sm:$0xff]  ;;  %v306_v48 = vunpack.c.h.s8.bf16 %v154_v44 }
  0xda   :  { %727 = vmatprep.subr.bf16.mxu1 %v343_v49  ;;  %v370_v49 = vunpack.c.h.s8.bf16 %v186_v45 }
  0xdc   :  { %687 = vmatpush1.bf16.msra.mxu0 %v278_v52  ;;  %v151_v52 = vld [vmem:[#allocation5 + $0x98] sm:$0xff] }
  0xdd   :  { %728 = vmatpush1.bf16.msra.mxu1 %v342_v53  ;;  %688 = vmatprep.subr.bf16.mxu0 %v275_v54  ;;  %v183_v53 = vld [vmem:[#allocation5 + $0x198] sm:$0xff]  ;;  %v302_v54 = vunpack.c.l.s8.bf16 %v154_v44  ;;  %v299_v55 = vunpack.c.h.s8.bf16 %v151_v52  ;;  %v295_v62 = vunpack.c.l.s8.bf16 %v151_v52 }
  0xde   :  { %729 = vmatprep.subr.bf16.mxu1 %v339_v36  ;;  %v366_v36 = vunpack.c.l.s8.bf16 %v186_v45  ;;  %v363_v37 = vunpack.c.h.s8.bf16 %v183_v53  ;;  %v359_v63 = vunpack.c.l.s8.bf16 %v183_v53 }
  0xe0   :  { %689 = vmatpush1.bf16.msra.mxu0 %v274_v58  ;;  %v150_v58 = vld [vmem:[#allocation5 + $0x90] sm:$0xff] }
  0xe1   :  { %730 = vmatpush1.bf16.msra.mxu1 %v338_v59  ;;  %690 = vmatprep.subr.bf16.mxu0 %v271_v60  ;;  %v182_v59 = vld [vmem:[#allocation5 + $0x190] sm:$0xff]  ;;  %v298_v60 = vunpack.c.h.s8.bf16 %v150_v58 }
  0xe2   :  { %731 = vmatprep.subr.bf16.mxu1 %v335_v61  ;;  %v362_v61 = vunpack.c.h.s8.bf16 %v182_v59 }
  0xe4   :  { %691 = vmatpush1.bf16.msra.mxu0 %v270_v0  ;;  %v211_v0 = vld [vmem:[#allocation5 + $0x278] sm:$0xff] }
  0xe5   :  { %732 = vmatpush1.bf16.msra.mxu1 %v334_v1  ;;  %692 = vmatprep.subr.bf16.mxu0 %v267_v2  ;;  %v243_v1 = vld [vmem:[#allocation5 + $0x378] sm:$0xff]  ;;  %v294_v2 = vunpack.c.l.s8.bf16 %v150_v58  ;;  %v419_v4 = vunpack.c.h.s8.bf16 %v211_v0  ;;  %v415_v10 = vunpack.c.l.s8.bf16 %v211_v0 }
  0xe6   :  { %733 = vmatprep.subr.bf16.mxu1 %v331_v3  ;;  %v358_v3 = vunpack.c.l.s8.bf16 %v182_v59  ;;  %v483_v5 = vunpack.c.h.s8.bf16 %v243_v1  ;;  %v479_v11 = vunpack.c.l.s8.bf16 %v243_v1 }
  0xe8   :  { %693 = vmatpush1.bf16.msra.mxu0 %v266_v6  ;;  %v210_v6 = vld [vmem:[#allocation5 + $0x270] sm:$0xff] }
  0xe9   :  { %734 = vmatpush1.bf16.msra.mxu1 %v330_v7  ;;  %694 = vmatprep.subr.bf16.mxu0 %v263_v8  ;;  %v242_v7 = vld [vmem:[#allocation5 + $0x370] sm:$0xff]  ;;  %v418_v8 = vunpack.c.h.s8.bf16 %v210_v6 }
  0xea   :  { %735 = vmatprep.subr.bf16.mxu1 %v327_v9  ;;  %v482_v9 = vunpack.c.h.s8.bf16 %v242_v7 }
  0xec   :  { %695 = vmatpush1.bf16.msra.mxu0 %v262_v12  ;;  %v207_v12 = vld [vmem:[#allocation5 + $0x258] sm:$0xff] }
  0xed   :  { %736 = vmatpush1.bf16.msra.mxu1 %v326_v13  ;;  %696 = vmatprep.subr.bf16.mxu0 %v323_v14  ;;  %v239_v13 = vld [vmem:[#allocation5 + $0x358] sm:$0xff]  ;;  %v414_v14 = vunpack.c.l.s8.bf16 %v210_v6  ;;  %v411_v16 = vunpack.c.h.s8.bf16 %v207_v12 }
  0xee   :  { %737 = vmatprep.subr.bf16.mxu1 %v387_v15  ;;  %v478_v15 = vunpack.c.l.s8.bf16 %v242_v7  ;;  %v475_v17 = vunpack.c.h.s8.bf16 %v239_v13 }
  0xf0   :  { %697 = vmatpush2.bf16.msra.mxu0 %v322_v18  ;;  %v206_v18 = vld [vmem:[#allocation5 + $0x250] sm:$0xff] }
  0xf1   :  { %738 = vmatpush2.bf16.msra.mxu1 %v386_v19  ;;  %698 = vmatprep.subr.bf16.mxu0 %v319_v20  ;;  %v238_v19 = vld [vmem:[#allocation5 + $0x350] sm:$0xff]  ;;  %v410_v20 = vunpack.c.h.s8.bf16 %v206_v18 }
  0xf2   :  { %739 = vmatprep.subr.bf16.mxu1 %v383_v21  ;;  %v471_v21 = vunpack.c.l.s8.bf16 %v239_v13 }
  0xf4   :  { %699 = vmatpush2.bf16.msra.mxu0 %v318_v24  ;;  %v406_v24 = vunpack.c.l.s8.bf16 %v206_v18 }
  0xf5   :  { %740 = vmatpush2.bf16.msra.mxu1 %v382_v25  ;;  %700 = vmatprep.subr.bf16.mxu0 %v315_v26  ;;  %v470_v25 = vunpack.c.l.s8.bf16 %v238_v19  ;;  %v403_v26 = vunpack.c.h.s8.bf16 %v203_v22 }
  0xf6   :  { %741 = vmatprep.subr.bf16.mxu1 %v379_v27  ;;  %v202_v27 = vld [vmem:[#allocation5 + $0x230] sm:$0xff] }
  0xf7   :  { %v402_v30 = vunpack.c.h.s8.bf16 %v202_v27  ;;  %v398_v38 = vunpack.c.l.s8.bf16 %v202_v27 }
  0xf8   :  { %701 = vmatpush2.bf16.msra.mxu0 %v314_v32  ;;  %v399_v32 = vunpack.c.l.s8.bf16 %v203_v22 }
  0xf9   :  { %742 = vmatpush2.bf16.msra.mxu1 %v378_v33  ;;  %702 = vmatprep.subr.bf16.mxu0 %v311_v34  ;;  %v463_v33 = vunpack.c.l.s8.bf16 %v235_v23  ;;  %v199_v34 = vld [vmem:[#allocation5 + $0x218] sm:$0xff] }
  0xfa   :  { %743 = vmatprep.subr.bf16.mxu1 %v375_v35  ;;  %v231_v35 = vld [vmem:[#allocation5 + $0x318] sm:$0xff] }
  0xfc   :  { %703 = vmatpush2.bf16.msra.mxu0 %v310_v40  ;;  %v395_v40 = vunpack.c.h.s8.bf16 %v199_v34 }
  0xfd   :  { %744 = vmatpush2.bf16.msra.mxu1 %v374_v41  ;;  %704 = vmatprep.subr.bf16.mxu0 %v307_v42  ;;  %v459_v41 = vunpack.c.h.s8.bf16 %v231_v35  ;;  %v198_v42 = vld [vmem:[#allocation5 + $0x210] sm:$0xff] }
  0xfe   :  { %745 = vmatprep.subr.bf16.mxu1 %v371_v43  ;;  %v230_v43 = vld [vmem:[#allocation5 + $0x310] sm:$0xff]  ;;  %v394_v44 = vunpack.c.h.s8.bf16 %v198_v42  ;;  %v390_v52 = vunpack.c.l.s8.bf16 %v198_v42 }
  0xff   :  { %v458_v45 = vunpack.c.h.s8.bf16 %v230_v43  ;;  %v454_v53 = vunpack.c.l.s8.bf16 %v230_v43 }
 0x100   :  { %705 = vmatpush2.bf16.msra.mxu0 %v306_v48  ;;  %v391_v48 = vunpack.c.l.s8.bf16 %v199_v34 }
 0x101   :  { %746 = vmatpush2.bf16.msra.mxu1 %v370_v49  ;;  %706 = vmatprep.subr.bf16.mxu0 %v303_v50  ;;  %v455_v49 = vunpack.c.l.s8.bf16 %v231_v35  ;;  %v227_v50 = vld [vmem:[#allocation5 + $0x2f8] sm:$0xff] }
 0x102   :  { %747 = vmatprep.subr.bf16.mxu1 %v367_v51  ;;  %v259_v51 = vld [vmem:[#allocation5 + $0x3f8] sm:$0xff] }
 0x104   :  { %707 = vmatpush2.bf16.msra.mxu0 %v302_v54  ;;  %v451_v54 = vunpack.c.h.s8.bf16 %v227_v50 }
 0x105   :  { %748 = vmatpush2.bf16.msra.mxu1 %v366_v36  ;;  %708 = vmatprep.subr.bf16.mxu0 %v299_v55  ;;  %v515_v36 = vunpack.c.h.s8.bf16 %v259_v51  ;;  %v226_v55 = vld [vmem:[#allocation5 + $0x2f0] sm:$0xff] }
 0x106   :  { %749 = vmatprep.subr.bf16.mxu1 %v363_v37  ;;  %v258_v37 = vld [vmem:[#allocation5 + $0x3f0] sm:$0xff]  ;;  %v450_v58 = vunpack.c.h.s8.bf16 %v226_v55  ;;  %v446_v0 = vunpack.c.l.s8.bf16 %v226_v55 }
 0x107   :  { %v514_v59 = vunpack.c.h.s8.bf16 %v258_v37  ;;  %v510_v1 = vunpack.c.l.s8.bf16 %v258_v37 }
 0x108   :  { %709 = vmatpush2.bf16.msra.mxu0 %v298_v60  ;;  %v447_v60 = vunpack.c.l.s8.bf16 %v227_v50 }
 0x109   :  { %750 = vmatpush2.bf16.msra.mxu1 %v362_v61  ;;  %710 = vmatprep.subr.bf16.mxu0 %v295_v62  ;;  %v511_v61 = vunpack.c.l.s8.bf16 %v259_v51  ;;  %v223_v62 = vld [vmem:[#allocation5 + $0x2d8] sm:$0xff] }
 0x10a   :  { %751 = vmatprep.subr.bf16.mxu1 %v359_v63  ;;  %v255_v63 = vld [vmem:[#allocation5 + $0x3d8] sm:$0xff] }
 0x10c   :  { %711 = vmatpush2.bf16.msra.mxu0 %v294_v2  ;;  %v443_v2 = vunpack.c.h.s8.bf16 %v223_v62 }
 0x10d   :  { %752 = vmatpush2.bf16.msra.mxu1 %v358_v3  ;;  %762 = vmatprep.subr.bf16.mxu0 %v419_v4  ;;  %v507_v3 = vunpack.c.h.s8.bf16 %v255_v63  ;;  %v222_v4 = vld [vmem:[#allocation5 + $0x2d0] sm:$0xff] }
 0x10e   :  { %803 = vmatprep.subr.bf16.mxu1 %v483_v5  ;;  %v254_v5 = vld [vmem:[#allocation5 + $0x3d0] sm:$0xff]  ;;  %v442_v6 = vunpack.c.h.s8.bf16 %v222_v4 }
 0x10f   :  { %713 = vmatmul.mubr.bf16.vlgmr.msra.gmra.mxu0 %v1909_v46  ;;  %v474_v46 = vunpack.c.h.s8.bf16 %v238_v19  ;;  %v506_v7 = vunpack.c.h.s8.bf16 %v254_v5  ;;  %v502_v13 = vunpack.c.l.s8.bf16 %v254_v5 }
 0x110   :  { %754 = vmatmul.mubr.bf16.vlgmr.msra.gmra.mxu1 %v1911_v47  ;;  %763 = vmatpush1.bf16.msra.mxu0 %v418_v8  ;;  %v407_v47 = vunpack.c.l.s8.bf16 %v207_v12  ;;  %v439_v8 = vunpack.c.l.s8.bf16 %v223_v62  ;;  %v438_v12 = vunpack.c.l.s8.bf16 %v222_v4 }
 0x111   :  { %804 = vmatpush1.bf16.msra.mxu1 %v482_v9  ;;  %764 = vmatprep.subr.bf16.mxu0 %v415_v10  ;;  %v503_v9 = vunpack.c.l.s8.bf16 %v255_v63  ;;  %v219_v10 = vld [vmem:[#allocation5 + $0x2b8] sm:$0xff] }
 0x112   :  { %805 = vmatprep.subr.bf16.mxu1 %v479_v11  ;;  %794 = vmatprep.mubr.bf16.mxu0 %v1913_v56  ;;  %v467_v56 = vunpack.c.h.s8.bf16 %v235_v23  ;;  %v251_v11 = vld [vmem:[#allocation5 + $0x3b8] sm:$0xff] }
 0x113   :  { %835 = vmatprep.mubr.bf16.mxu1 %v1915_v57  ;;  %v234_v57 = vld [vmem:[#allocation5 + $0x330] sm:$0xff] }
 0x114   :  { %765 = vmatpush1.bf16.msra.mxu0 %v414_v14  ;;  %v466_v31 = vunpack.c.h.s8.bf16 %v234_v57  ;;  %v462_v39 = vunpack.c.l.s8.bf16 %v234_v57  ;;  %v435_v14 = vunpack.c.h.s8.bf16 %v219_v10 }
 0x115   :  { %806 = vmatpush1.bf16.msra.mxu1 %v478_v15  ;;  %766 = vmatprep.subr.bf16.mxu0 %v411_v16  ;;  %v499_v15 = vunpack.c.h.s8.bf16 %v251_v11  ;;  %v218_v16 = vld [vmem:[#allocation5 + $0x2b0] sm:$0xff] }
 0x116   :  { %807 = vmatprep.subr.bf16.mxu1 %v475_v17  ;;  %v250_v17 = vld [vmem:[#allocation5 + $0x3b0] sm:$0xff]  ;;  %v434_v18 = vunpack.c.h.s8.bf16 %v218_v16  ;;  %v430_v22 = vunpack.c.l.s8.bf16 %v218_v16 }
 0x117   :  { %v498_v19 = vunpack.c.h.s8.bf16 %v250_v17  ;;  %v494_v23 = vunpack.c.l.s8.bf16 %v250_v17 }
 0x118   :  { %767 = vmatpush1.bf16.msra.mxu0 %v410_v20  ;;  %v431_v20 = vunpack.c.l.s8.bf16 %v219_v10 }
 0x119   :  { %808 = vmatpush1.bf16.msra.mxu1 %v474_v46  ;;  %768 = vmatprep.subr.bf16.mxu0 %v407_v47  ;;  %v495_v46 = vunpack.c.l.s8.bf16 %v251_v11  ;;  %v215_v47 = vld [vmem:[#allocation5 + $0x298] sm:$0xff] }
 0x11a   :  { %809 = vmatprep.subr.bf16.mxu1 %v471_v21  ;;  %v247_v21 = vld [vmem:[#allocation5 + $0x398] sm:$0xff] }
 0x11c   :  { %769 = vmatpush1.bf16.msra.mxu0 %v406_v24  ;;  %v427_v24 = vunpack.c.h.s8.bf16 %v215_v47 }
 0x11d   :  { %810 = vmatpush1.bf16.msra.mxu1 %v470_v25  ;;  %770 = vmatprep.subr.bf16.mxu0 %v403_v26  ;;  %v491_v25 = vunpack.c.h.s8.bf16 %v247_v21  ;;  %v214_v26 = vld [vmem:[#allocation5 + $0x290] sm:$0xff] }
 0x11e   :  { %811 = vmatprep.subr.bf16.mxu1 %v467_v56  ;;  %v246_v56 = vld [vmem:[#allocation5 + $0x390] sm:$0xff]  ;;  %v426_v27 = vunpack.c.h.s8.bf16 %v214_v26 }
 0x11f   :  { %v490_v57 = vunpack.c.h.s8.bf16 %v246_v56 }
 0x120   :  { %771 = vmatpush1.bf16.msra.mxu0 %v402_v30  ;;  %v423_v30 = vunpack.c.l.s8.bf16 %v215_v47 }
 0x121   :  { %812 = vmatpush1.bf16.msra.mxu1 %v466_v31  ;;  %772 = vmatprep.subr.bf16.mxu0 %v399_v32  ;;  %v487_v31 = vunpack.c.l.s8.bf16 %v247_v21  ;;  %v422_v32 = vunpack.c.l.s8.bf16 %v214_v26 }
 0x122   :  { %813 = vmatprep.subr.bf16.mxu1 %v463_v33  ;;  %v486_v33 = vunpack.c.l.s8.bf16 %v246_v56 }
 0x124   :  { %773 = vmatpush1.bf16.msra.mxu0 %v398_v38 }
 0x125   :  { %814 = vmatpush1.bf16.msra.mxu1 %v462_v39  ;;  %774 = vmatprep.subr.bf16.mxu0 %v395_v40 }
 0x126   :  { %815 = vmatprep.subr.bf16.mxu1 %v459_v41 }
 0x128   :  { %775 = vmatpush1.bf16.msra.mxu0 %v394_v44 }
 0x129   :  { %816 = vmatpush1.bf16.msra.mxu1 %v458_v45  ;;  %776 = vmatprep.subr.bf16.mxu0 %v391_v48 }
 0x12a   :  { %817 = vmatprep.subr.bf16.mxu1 %v455_v49 }
 0x12c   :  { %777 = vmatpush1.bf16.msra.mxu0 %v390_v52 }
 0x12d   :  { %818 = vmatpush1.bf16.msra.mxu1 %v454_v53  ;;  %778 = vmatprep.subr.bf16.mxu0 %v451_v54 }
 0x12e   :  { %819 = vmatprep.subr.bf16.mxu1 %v515_v36 }
 0x130   :  { %779 = vmatpush2.bf16.msra.mxu0 %v450_v58 }
 0x131   :  { %820 = vmatpush2.bf16.msra.mxu1 %v514_v59  ;;  %780 = vmatprep.subr.bf16.mxu0 %v447_v60 }
 0x132   :  { %821 = vmatprep.subr.bf16.mxu1 %v511_v61 }
 0x134   :  { %781 = vmatpush2.bf16.msra.mxu0 %v446_v0 }
 0x135   :  { %822 = vmatpush2.bf16.msra.mxu1 %v510_v1  ;;  %782 = vmatprep.subr.bf16.mxu0 %v443_v2 }
 0x136   :  { %823 = vmatprep.subr.bf16.mxu1 %v507_v3 }
 0x138   :  { %783 = vmatpush2.bf16.msra.mxu0 %v442_v6 }
 0x139   :  { %824 = vmatpush2.bf16.msra.mxu1 %v506_v7  ;;  %784 = vmatprep.subr.bf16.mxu0 %v439_v8  ;;  %v1083_v8 = vld [vmem:[#allocation10 + $0x38] sm:$0xff] }
 0x13a   :  { %825 = vmatprep.subr.bf16.mxu1 %v503_v9  ;;  %v1099_v9 = vld [vmem:[#allocation10 + $0xb8] sm:$0xff]  ;;  %v1123_v10 = vunpack.c.h.s8.bf16 %v1083_v8 }
 0x13b   :  { %v1155_v11 = vunpack.c.h.s8.bf16 %v1099_v9 }
 0x13c   :  { %785 = vmatpush2.bf16.msra.mxu0 %v438_v12  ;;  %v1082_v12 = vld [vmem:[#allocation10 + $0x30] sm:$0xff] }
 0x13d   :  { %826 = vmatpush2.bf16.msra.mxu1 %v502_v13  ;;  %786 = vmatprep.subr.bf16.mxu0 %v435_v14  ;;  %v1098_v13 = vld [vmem:[#allocation10 + $0xb0] sm:$0xff] }
 0x13e   :  { %827 = vmatprep.subr.bf16.mxu1 %v499_v15 }
 0x140   :  { %787 = vmatpush2.bf16.msra.mxu0 %v434_v18  ;;  %v1122_v18 = vunpack.c.h.s8.bf16 %v1082_v12 }
 0x141   :  { %828 = vmatpush2.bf16.msra.mxu1 %v498_v19  ;;  %788 = vmatprep.subr.bf16.mxu0 %v431_v20  ;;  %v1154_v19 = vunpack.c.h.s8.bf16 %v1098_v13 }
 0x142   :  { %829 = vmatprep.subr.bf16.mxu1 %v495_v46 }
 0x144   :  { %789 = vmatpush2.bf16.msra.mxu0 %v430_v22  ;;  %v921_v22 = vlaneseq }
 0x145   :  { %830 = vmatpush2.bf16.msra.mxu1 %v494_v23  ;;  %790 = vmatprep.subr.bf16.mxu0 %v427_v24  ;;  %v1121_v23 = vunpack.c.l.s8.bf16 %v1083_v8  ;;  %v1153_v24 = vunpack.c.l.s8.bf16 %v1099_v9 }
 0x146   :  { %831 = vmatprep.subr.bf16.mxu1 %v491_v25 }
 0x148   :  { %791 = vmatpush2.bf16.msra.mxu0 %v426_v27 }
 0x149   :  { %832 = vmatpush2.bf16.msra.mxu1 %v490_v57  ;;  %792 = vmatprep.subr.bf16.mxu0 %v423_v30  ;;  %v1120_v57 = vunpack.c.l.s8.bf16 %v1082_v12  ;;  %v1152_v30 = vunpack.c.l.s8.bf16 %v1098_v13 }
 0x14a   :  { %833 = vmatprep.subr.bf16.mxu1 %v487_v31 }
 0x14c   :  { %793 = vmatpush2.bf16.msra.mxu0 %v422_v32  ;;  %v1081_v32 = vld [vmem:[#allocation10 + $0x28] sm:$0xff] }
 0x14d   :  { %834 = vmatpush2.bf16.msra.mxu1 %v486_v33  ;;  %1172 = vmatprep.subr.bf16.mxu0 %v1123_v10  ;;  %v1097_v33 = vld [vmem:[#allocation10 + $0xa8] sm:$0xff] }
 0x14e   :  { %1213 = vmatprep.subr.bf16.mxu1 %v1155_v11  ;;  %v1077_v10 = vld [vmem:[#allocation10 + $0x8] sm:$0xff] }
 0x14f   :  { %v550_v34 = vpop.f32.mrf.mxu0  ;;  %795 = vmatmul.mubr.bf16.vlgmr.msra.gmra.mxu0 %v1921_v28  ;;  %v1093_v11 = vld [vmem:[#allocation10 + $0x88] sm:$0xff] }
 0x150   :  { %v591_v35 = vpop.f32.mrf.mxu1  ;;  %836 = vmatmul.mubr.bf16.vlgmr.msra.gmra.mxu1 %v1923_v29  ;;  %1173 = vmatpush1.bf16.msra.mxu0 %v1122_v18  ;;  %v1092_v18 = vld [vmem:[#allocation10 + $0x80] sm:$0xff] }
 0x151   :  { %v592_v38 = vadd.f32 %v591_v35, %v550_v34  ;;  %v552_v39 = vpop.f32.mrf.mxu0  ;;  %1214 = vmatpush1.bf16.msra.mxu1 %v1154_v19  ;;  %1174 = vmatprep.subr.bf16.mxu0 %v1121_v23  ;;  %v1119_v35 = vunpack.c.h.s8.bf16 %v1081_v32  ;;  %v1091_v23 = vld [vmem:[#allocation10 + $0x78] sm:$0xff] }
 0x152   :  { %v593_v40 = vpop.f32.mrf.mxu1  ;;  %1215 = vmatprep.subr.bf16.mxu1 %v1153_v24  ;;  %v1107_v24 = vld [vmem:[#allocation10 + $0xf8] sm:$0xff] }
 0x153   :  { %v594_v41 = vadd.f32 %v593_v40, %v552_v39  ;;  %v554_v42 = vpop.f32.mrf.mxu0  ;;  %v1080_v39 = vld [vmem:[#allocation10 + $0x20] sm:$0xff] }
 0x154   :  { %v595_v43 = vpop.f32.mrf.mxu1  ;;  %1175 = vmatpush1.bf16.msra.mxu0 %v1120_v57  ;;  %v1096_v40 = vld [vmem:[#allocation10 + $0xa0] sm:$0xff]  ;;  %v1139_v57 = vunpack.c.h.s8.bf16 %v1091_v23 }
 0x155   :  { %v555_v44 = vpop.f32.mrf.mxu0  ;;  %1216 = vmatpush1.bf16.msra.mxu1 %v1152_v30  ;;  %1176 = vmatprep.subr.bf16.mxu0 %v1119_v35  ;;  %v1171_v30 = vunpack.c.h.s8.bf16 %v1107_v24 }
 0x156   :  { %v596_v45 = vpop.f32.mrf.mxu1  ;;  %v1955_v44 = vshrl.u32 %v921_v22, 7  ;;  %v1141_v22 = vunpack.c.l.s8.bf16 %v1093_v11 }
 0x157   :  { %v1118_v45 = vunpack.c.h.s8.bf16 %v1080_v39 }
 0x159   :  { %1177 = vmatpush1.bf16.msra.mxu0 %v1118_v45 }
 0x18f   :  { %v632_v48 = vpop.f32.mrf.mxu0 }
 0x190   :  { %v673_v49 = vpop.f32.mrf.mxu1  ;;  %v633_v50 = vadd.f32 %v632_v48, %v592_v38  ;;  %v1151_v38 = vunpack.c.h.s8.bf16 %v1097_v33 }
 0x191   :  { %v634_v51 = vpop.f32.mrf.mxu0 }
 0x192   :  { %v675_v52 = vpop.f32.mrf.mxu1  ;;  %v1935_v53 = vadd.f32 %v673_v49, %v633_v50  ;;  %v635_v54 = vadd.f32 %v634_v51, %v594_v41  ;;  %v1951_v41 = vld [vmem:[#allocation7] sm:$0xf]  ;;  %1217 = vmatprep.subr.bf16.mxu1 %v1151_v38  ;;  %v1150_v49 = vunpack.c.h.s8.bf16 %v1096_v40  ;;  %v1137_v38 = vunpack.c.l.s8.bf16 %v1091_v23 }
 0x193   :  { %v636_v36 = vpop.f32.mrf.mxu0  ;;  %v1961_v51 = vmul.f32 %v1951_v41, %v1951_v41 }
 0x194   :  { %v677_v28 = vpop.f32.mrf.mxu1  ;;  %v845_v29 = vrot.slane %v1935_v53, 4  ;;  %v873_v55 = vmul.f32 %v1935_v53, %v1935_v53  ;;  %v1940_v37 = vadd.f32 %v675_v52, %v635_v54  ;;  %1218 = vmatpush1.bf16.msra.mxu1 %v1150_v49  ;;  %v1117_v52 = vunpack.c.l.s8.bf16 %v1081_v32  ;;  %v1106_v32 = vld [vmem:[#allocation10 + $0xf0] sm:$0xff] }
 0x195   :  { %v637_v58 = vpop.f32.mrf.mxu0  ;;  %v1149_v54 = vunpack.c.l.s8.bf16 %v1097_v33  ;;  %v1964_v28 = vsub.s32 0, %v1955_v44  ;;  %v1170_v35 = vunpack.c.h.s8.bf16 %v1106_v32  ;;  %v1168_v45 = vunpack.c.l.s8.bf16 %v1106_v32 }
 0x196   :  { %v678_v59 = vpop.f32.mrf.mxu1  ;;  %v846_v60 = vadd.f32 %v845_v29, %v1935_v53  ;;  %v877_v61 = vrot.slane %v873_v55, 4  ;;  %v851_v62 = vrot.slane %v1940_v37, 4  ;;  %v874_v63 = vmul.f32 %v1940_v37, %v1940_v37  ;;  %1178 = vmatprep.subr.bf16.mxu0 %v1117_v52  ;;  %v1104_v52 = vld [vmem:[#allocation10 + $0xe0] sm:$0xff] }
 0x197   :  { %v1116_v29 = vunpack.c.l.s8.bf16 %v1080_v39  ;;  %1219 = vmatprep.subr.bf16.mxu1 %v1149_v54  ;;  %v1967_v59 = vsub.s32 1, %v1955_v44  ;;  %v1169_v39 = vunpack.c.l.s8.bf16 %v1107_v24 }
 0x198   :  { %v847_v0 = vrot.slane %v846_v60, 2  ;;  %v878_v1 = vadd.f32 %v877_v61, %v873_v55  ;;  %v852_v2 = vadd.f32 %v851_v62, %v1940_v37  ;;  %v883_v3 = vrot.slane %v874_v63, 4  ;;  %v1095_v61 = vld [vmem:[#allocation10 + $0x98] sm:$0xff] }
 0x199   :  { %v1148_v55 = vunpack.c.l.s8.bf16 %v1096_v40  ;;  %1179 = vmatpush1.bf16.msra.mxu0 %v1116_v29  ;;  %v1145_v9 = vunpack.c.l.s8.bf16 %v1095_v61  ;;  %v1089_v40 = vld [vmem:[#allocation10 + $0x68] sm:$0xff] }
 0x19a   :  { %v848_v4 = vadd.f32 %v847_v0, %v846_v60  ;;  %v879_v5 = vrot.slane %v878_v1, 2  ;;  %v853_v6 = vrot.slane %v852_v2, 2  ;;  %v884_v7 = vadd.f32 %v883_v3, %v874_v63  ;;  %v1079_v60 = vld [vmem:[#allocation10 + $0x18] sm:$0xff]  ;;  %v1078_v0 = vld [vmem:[#allocation10 + $0x10] sm:$0xff] }
 0x19b   :  { %1220 = vmatpush1.bf16.msra.mxu1 %v1148_v55  ;;  %v1115_v62 = vunpack.c.h.s8.bf16 %v1079_v60  ;;  %v1147_v63 = vunpack.c.h.s8.bf16 %v1095_v61  ;;  %v924_v3 = vrot.slane %v1961_v51, %v1964_v28  ;;  %v1113_v8 = vunpack.c.l.s8.bf16 %v1079_v60  ;;  %v1087_v60 = vld [vmem:[#allocation10 + $0x58] sm:$0xff] }
 0x19c   :  { %v849_v14 = vrot.slane %v848_v4, 1  ;;  %v880_v15 = vadd.f32 %v879_v5, %v878_v1  ;;  %v854_v16 = vadd.f32 %v853_v6, %v852_v2  ;;  %v885_v17 = vrot.slane %v884_v7, 2  ;;  %v1094_v1 = vld [vmem:[#allocation10 + $0x90] sm:$0xff]  ;;  %v1103_v61 = vld [vmem:[#allocation10 + $0xd8] sm:$0xff] }
 0x19d   :  { %v1146_v5 = vunpack.c.h.s8.bf16 %v1094_v1  ;;  %1180 = vmatprep.subr.bf16.mxu0 %v1115_v62  ;;  %1221 = vmatprep.subr.bf16.mxu1 %v1147_v63  ;;  %v1112_v12 = vunpack.c.l.s8.bf16 %v1078_v0  ;;  %v1144_v13 = vunpack.c.l.s8.bf16 %v1094_v1  ;;  %v1133_v29 = vunpack.c.l.s8.bf16 %v1089_v40 }
 0x19e   :  { %v850_v20 = vadd.f32 %v849_v14, %v848_v4  ;;  %v881_v46 = vrot.slane %v880_v15, 1  ;;  %v855_v47 = vrot.slane %v854_v16, 1  ;;  %v886_v21 = vadd.f32 %v885_v17, %v884_v7  ;;  %v1076_v17 = vld [vmem:[#allocation10] sm:$0xff] }
 0x19f   :  { %v1114_v4 = vunpack.c.h.s8.bf16 %v1078_v0  ;;  %v928_v7 = vrot.slane %v1961_v51, %v1967_v59  ;;  %1222 = vmatpush1.bf16.msra.mxu1 %v1146_v5  ;;  %v1164_v0 = vunpack.c.l.s8.bf16 %v1104_v52  ;;  %v1102_v5 = vld [vmem:[#allocation10 + $0xd0] sm:$0xff] }
 0x1a0   :  { %v1947_v25 = vmul.f32 0.125, %v850_v20  ;;  %v882_v26 = vadd.f32 %v881_v46, %v880_v15  ;;  %v856_v56 = vadd.f32 %v855_v47, %v854_v16  ;;  %v887_v27 = vrot.slane %v886_v21, 1  ;;  %1223 = vmatprep.subr.bf16.mxu1 %v1145_v9 }
 0x1a1   :  { %1181 = vmatpush1.bf16.msra.mxu0 %v1114_v4  ;;  %v1111_v15 = vunpack.c.h.s8.bf16 %v1077_v10  ;;  %v1143_v16 = vunpack.c.h.s8.bf16 %v1093_v11  ;;  %v1110_v20 = vunpack.c.h.s8.bf16 %v1076_v17  ;;  %v1142_v46 = vunpack.c.h.s8.bf16 %v1092_v18  ;;  %v1086_v4 = vld [vmem:[#allocation10 + $0x50] sm:$0xff]  ;;  %v1101_v11 = vld [vmem:[#allocation10 + $0xc8] sm:$0xff] }
 0x1a2   :  { %v888_v31 = vadd.f32 %v887_v27, %v886_v21  ;;  %v1949_v34 = vmul.f32 0.125, %v856_v56  ;;  %v901_v42 = vmul.f32 0.125, %v882_v26  ;;  %v905_v43 = vmul.f32 %v1947_v25, %v1947_v25  ;;  %1182 = vmatprep.subr.bf16.mxu0 %v1113_v8 }
 0x1a3   :  { %1224 = vmatpush1.bf16.msra.mxu1 %v1144_v13  ;;  %v1109_v21 = vunpack.c.l.s8.bf16 %v1077_v10  ;;  %v1108_v56 = vunpack.c.l.s8.bf16 %v1076_v17  ;;  %v1140_v27 = vunpack.c.l.s8.bf16 %v1092_v18  ;;  %v1129_v8 = vunpack.c.l.s8.bf16 %v1087_v60  ;;  %v1085_v10 = vld [vmem:[#allocation10 + $0x48] sm:$0xff] }
 0x1a4   :  { %v902_v48 = vmul.f32 0.125, %v888_v31  ;;  %v906_v50 = vmul.f32 %v1949_v34, %v1949_v34  ;;  %v909_v36 = vsub.f32 %v901_v42, %v905_v43  ;;  %1225 = vmatprep.subr.bf16.mxu1 %v1143_v16  ;;  %v1090_v31 = vld [vmem:[#allocation10 + $0x70] sm:$0xff]  ;;  %v1105_v42 = vld [vmem:[#allocation10 + $0xe8] sm:$0xff]  ;;  %v1161_v9 = vunpack.c.l.s8.bf16 %v1103_v61 }
 0x1a5   :  { %1183 = vmatpush1.bf16.msra.mxu0 %v1112_v12  ;;  %v1138_v33 = vunpack.c.h.s8.bf16 %v1090_v31  ;;  %v1136_v43 = vunpack.c.l.s8.bf16 %v1090_v31  ;;  %v1167_v49 = vunpack.c.h.s8.bf16 %v1105_v42  ;;  %v1165_v55 = vunpack.c.l.s8.bf16 %v1105_v42 }
 0x1a6   :  { %v910_v58 = vsub.f32 %v902_v48, %v906_v50  ;;  %v913_v2 = vmax.f32 %v909_v36, 0.0  ;;  %1184 = vmatprep.subr.bf16.mxu0 %v1111_v15  ;;  %v1135_v48 = vunpack.c.h.s8.bf16 %v1089_v40  ;;  %v1088_v50 = vld [vmem:[#allocation10 + $0x60] sm:$0xff]  ;;  %v1166_v36 = vunpack.c.h.s8.bf16 %v1104_v52 }
 0x1a7   :  { %1226 = vmatpush1.bf16.msra.mxu1 %v1142_v46  ;;  %v1134_v54 = vunpack.c.h.s8.bf16 %v1088_v50  ;;  %v1132_v63 = vunpack.c.l.s8.bf16 %v1088_v50  ;;  %v1160_v15 = vunpack.c.l.s8.bf16 %v1102_v5  ;;  %v1127_v17 = vunpack.c.h.s8.bf16 %v1085_v10 }
 0x1a8   :  { %v914_v6 = vmax.f32 %v910_v58, 0.0  ;;  %v941_v14 = vmul.f32 %v924_v3, %v913_v2  ;;  %1227 = vmatprep.subr.bf16.mxu1 %v1141_v22  ;;  %v1131_v2 = vunpack.c.h.s8.bf16 %v1087_v60  ;;  %v1163_v3 = vunpack.c.h.s8.bf16 %v1103_v61 }
 0x1a9   :  { %1185 = vmatpush1.bf16.msra.mxu0 %v1110_v20  ;;  %v1159_v18 = vunpack.c.h.s8.bf16 %v1101_v11  ;;  %v1100_v20 = vld [vmem:[#allocation10 + $0xc0] sm:$0xff] }
 0x1aa   :  { %v942_v19 = vmul.f32 %v928_v7, %v914_v6  ;;  %v945_v47 = vadd.f32 1e-05, %v941_v14  ;;  %1186 = vmatprep.subr.bf16.mxu0 %v1109_v21  ;;  %v1130_v6 = vunpack.c.h.s8.bf16 %v1086_v4  ;;  %v1162_v7 = vunpack.c.h.s8.bf16 %v1102_v5 }
 0x1ab   :  { %1228 = vmatpush1.bf16.msra.mxu1 %v1140_v27  ;;  %v1128_v14 = vunpack.c.l.s8.bf16 %v1086_v4  ;;  %v1158_v24 = vunpack.c.h.s8.bf16 %v1100_v20  ;;  %v1156_v31 = vunpack.c.l.s8.bf16 %v1100_v20 }
 0x1ac   :  { %v946_v26 = vadd.f32 1e-05, %v942_v19  ;;  %1647 = vrsqrt.f32 %v945_v47  ;;  %1229 = vmatprep.subr.bf16.mxu1 %v1171_v30  ;;  %v1084_v19 = vld [vmem:[#allocation10 + $0x40] sm:$0xff] }
 0x1ad   :  { %1187 = vmatpush1.bf16.msra.mxu0 %v1108_v56  ;;  %v1126_v23 = vunpack.c.h.s8.bf16 %v1084_v19  ;;  %v1157_v56 = vunpack.c.l.s8.bf16 %v1101_v11  ;;  %v1124_v30 = vunpack.c.l.s8.bf16 %v1084_v19 }
 0x1ae   :  { %1649 = vrsqrt.f32 %v946_v26  ;;  %1188 = vmatprep.subr.bf16.mxu0 %v1139_v57  ;;  %v1125_v26 = vunpack.c.l.s8.bf16 %v1085_v10 }
 0x1af   :  { %1230 = vmatpush2.bf16.msra.mxu1 %v1170_v35 }
 0x1b0   :  { %1231 = vmatprep.subr.bf16.mxu1 %v1169_v39 }
 0x1b1   :  { %1189 = vmatpush2.bf16.msra.mxu0 %v1138_v33 }
 0x1b2   :  { %1190 = vmatprep.subr.bf16.mxu0 %v1137_v38 }
 0x1b3   :  { %1232 = vmatpush2.bf16.msra.mxu1 %v1168_v45 }
 0x1b4   :  { %1233 = vmatprep.subr.bf16.mxu1 %v1167_v49 }
 0x1b5   :  { %1191 = vmatpush2.bf16.msra.mxu0 %v1136_v43 }
 0x1b6   :  { %1192 = vmatprep.subr.bf16.mxu0 %v1135_v48 }
 0x1b7   :  { %1234 = vmatpush2.bf16.msra.mxu1 %v1166_v36 }
 0x1b8   :  { %1235 = vmatprep.subr.bf16.mxu1 %v1165_v55 }
 0x1b9   :  { %v1973_v58 = vpop.eup %1647  ;;  %1193 = vmatpush2.bf16.msra.mxu0 %v1134_v54 }
 0x1ba   :  { %1194 = vmatprep.subr.bf16.mxu0 %v1133_v29 }
 0x1bb   :  { %v1975_v62 = vpop.eup %1649  ;;  %1236 = vmatpush2.bf16.msra.mxu1 %v1164_v0 }
 0x1bc   :  { %v957_v1 = vcombine.low %v1973_v58, %v1975_v62  ;;  %1237 = vmatprep.subr.bf16.mxu1 %v1163_v3 }
 0x1bd   :  { %1195 = vmatpush2.bf16.msra.mxu0 %v1132_v63 }
 0x1be   :  { %1196 = vmatprep.subr.bf16.mxu0 %v1131_v2 }
 0x1bf   :  { %1238 = vmatpush2.bf16.msra.mxu1 %v1162_v7 }
 0x1c0   :  { %1239 = vmatprep.subr.bf16.mxu1 %v1161_v9 }
 0x1c1   :  { %1197 = vmatpush2.bf16.msra.mxu0 %v1130_v6 }
 0x1c2   :  { %1198 = vmatprep.subr.bf16.mxu0 %v1129_v8 }
 0x1c3   :  { %1240 = vmatpush2.bf16.msra.mxu1 %v1160_v15 }
 0x1c4   :  { %1241 = vmatprep.subr.bf16.mxu1 %v1159_v18 }
 0x1c5   :  { %1199 = vmatpush2.bf16.msra.mxu0 %v1128_v14 }
 0x1c6   :  { %1200 = vmatprep.subr.bf16.mxu0 %v1127_v17 }
 0x1c7   :  { %1242 = vmatpush2.bf16.msra.mxu1 %v1158_v24 }
 0x1c8   :  { %1243 = vmatprep.subr.bf16.mxu1 %v1157_v56 }
 0x1c9   :  { %1201 = vmatpush2.bf16.msra.mxu0 %v1126_v23 }
 0x1ca   :  { %1202 = vmatprep.subr.bf16.mxu0 %v1125_v26 }
 0x1cb   :  { %1244 = vmatpush2.bf16.msra.mxu1 %v1156_v31 }
 0x1cd   :  { %1203 = vmatpush2.bf16.msra.mxu0 %v1124_v30 }
 0x1cf   :  { %v714_v12 = vpop.f32.mrf.mxu0 }
 0x1d0   :  { %v755_v13 = vpop.f32.mrf.mxu1 }
 0x1d1   :  { %v756_v16 = vadd.f32 %v755_v13, %v714_v12  ;;  %v716_v46 = vpop.f32.mrf.mxu0 }
 0x1d2   :  { %v757_v47 = vpop.f32.mrf.mxu1 }
 0x1d3   :  { %v718_v21 = vpop.f32.mrf.mxu0  ;;  %v758_v35 = vadd.f32 %v757_v47, %v716_v46  ;;  %v935_v46 = vsub.s32 3, %v1955_v44 }
 0x1d4   :  { %v759_v22 = vpop.f32.mrf.mxu1 }
 0x1d5   :  { %v719_v27 = vpop.f32.mrf.mxu0  ;;  %v936_v31 = vrot.slane %v1961_v51, %v935_v46 }
 0x1d6   :  { %v760_v57 = vpop.f32.mrf.mxu1 }
 0x20f   :  { %v796_v32 = vpop.f32.mrf.mxu0 }
 0x210   :  { %v837_v33 = vpop.f32.mrf.mxu1  ;;  %v797_v38 = vadd.f32 %v796_v32, %v756_v16  ;;  %v1992_v16 = vsub.s32 2, %v1955_v44 }
 0x211   :  { %v798_v39 = vpop.f32.mrf.mxu0 }
 0x212   :  { %v839_v40 = vpop.f32.mrf.mxu1  ;;  %v1979_v42 = vadd.f32 %v837_v33, %v797_v38  ;;  %v799_v43 = vadd.f32 %v798_v39, %v758_v35  ;;  %v932_v26 = vrot.slane %v1961_v51, %v1992_v16  ;;  %v917_v51 = vld [vmem:[%s2068_s3] sm:$0xf] }
 0x213   :  { %v800_v45 = vpop.f32.mrf.mxu0 }
 0x214   :  { %v841_v48 = vpop.f32.mrf.mxu1  ;;  %v857_v49 = vrot.slane %v1979_v42, 4  ;;  %v875_v50 = vmul.f32 %v1979_v42, %v1979_v42  ;;  %v1984_v52 = vadd.f32 %v839_v40, %v799_v43  ;;  %v1823_v40 = vmov 1966171168  }
 0x215   :  { %v801_v54 = vpop.f32.mrf.mxu0  ;;  %v960_v43 = vunpack.c.l.s4 %v1823_v40  ;;  %v1643_v40 = vld [vmem:[#allocation11 + $0x48] sm:$0xff]  }
 0x216   :  { %v842_v36 = vpop.f32.mrf.mxu1  ;;  %v858_v29 = vadd.f32 %v857_v49, %v1979_v42  ;;  %v889_v55 = vrot.slane %v875_v50, 4  ;;  %v863_v60 = vrot.slane %v1984_v52, 4  ;;  %v876_v61 = vmul.f32 %v1984_v52, %v1984_v52 }
 0x217   :  { %v961_v45 = vunpack.c.0.s8 %v960_v43  ;;  %v1644_v43 = vld [vmem:[#allocation11 + $0x8] sm:$0xff]  }
 0x218   :  { %v859_v63 = vrot.slane %v858_v29, 2  ;;  %v890_v0 = vadd.f32 %v889_v55, %v875_v50  ;;  %v864_v2 = vadd.f32 %v863_v60, %v1984_v52  ;;  %v895_v3 = vrot.slane %v876_v61, 4 }
 0x219   :  { %v1999_v49 = vsub.s32 %v961_v45, %v1955_v44  ;;  %v918_v55 = vmul.f32 %v917_v51, %v1951_v41  ;;  %v1645_v45 = vld [vmem:[#allocation11 + $0x40] sm:$0xff]  }
 0x21a   :  { %v860_v4 = vadd.f32 %v859_v63, %v858_v29  ;;  %v891_v5 = vrot.slane %v890_v0, 2  ;;  %v865_v6 = vrot.slane %v864_v2, 2  ;;  %v896_v7 = vadd.f32 %v895_v3, %v876_v61 }
 0x21b   :  { %v965_v36 = vrot.slane %v957_v1, %v1999_v49 }
 0x21c   :  { %v861_v8 = vrot.slane %v860_v4, 1  ;;  %v892_v9 = vadd.f32 %v891_v5, %v890_v0  ;;  %v866_v10 = vadd.f32 %v865_v6, %v864_v2  ;;  %v897_v11 = vrot.slane %v896_v7, 2 }
 0x21e   :  { %v862_v12 = vadd.f32 %v861_v8, %v860_v4  ;;  %v893_v13 = vrot.slane %v892_v9, 1  ;;  %v867_v14 = vrot.slane %v866_v10, 1  ;;  %v898_v15 = vadd.f32 %v897_v11, %v896_v7 }
 0x220   :  { %v871_v17 = vmul.f32 0.125, %v862_v12  ;;  %v894_v18 = vadd.f32 %v893_v13, %v892_v9  ;;  %v868_v19 = vadd.f32 %v867_v14, %v866_v10  ;;  %v899_v20 = vrot.slane %v898_v15, 1  ;;  %v983_v12 = vld [vmem:[#allocation8] sm:$0xf] }
 0x222   :  { %v903_v47 = vmul.f32 0.125, %v894_v18  ;;  %v907_v21 = vmul.f32 %v871_v17, %v871_v17  ;;  %v872_v22 = vmul.f32 0.125, %v868_v19  ;;  %v900_v23 = vadd.f32 %v899_v20, %v898_v15 }
 0x224   :  { %v911_v24 = vsub.f32 %v903_v47, %v907_v21  ;;  %v904_v56 = vmul.f32 0.125, %v900_v23  ;;  %v908_v27 = vmul.f32 %v872_v22, %v872_v22 }
 0x226   :  { %v915_v57 = vmax.f32 %v911_v24, 0.0  ;;  %v912_v30 = vsub.f32 %v904_v56, %v908_v27  ;;  %v1633_v27 = vld [vmem:[#allocation11 + $0x70] sm:$0xff]  }
 0x228   :  { %v943_v32 = vmul.f32 %v932_v26, %v915_v57  ;;  %v916_v33 = vmax.f32 %v912_v30, 0.0  ;;  %v1635_v57 = vld [vmem:[#allocation11 + $0x68] sm:$0xff]  }
 0x229   :  { %v1636_v30 = vld [vmem:[#allocation11 + $0x28] sm:$0xff]  }
 0x22a   :  { %v947_v35 = vadd.f32 1e-05, %v943_v32  ;;  %v944_v38 = vmul.f32 %v936_v31, %v916_v33  ;;  %v1637_v31 = vld [vmem:[#allocation11 + $0x60] sm:$0xff]   ;;  %v1639_v33 = vld [vmem:[#allocation11 + $0x58] sm:$0xff]  }
 0x22b   :  { %v1638_v32 = vld [vmem:[#allocation11 + $0x20] sm:$0xff]  }
 0x22c   :  { %v948_v39 = vadd.f32 1e-05, %v944_v38  ;;  %1651 = vrsqrt.f32 %v947_v35  ;;  %v1640_v35 = vld [vmem:[#allocation11 + $0x18] sm:$0xff]   ;;  %v1641_v38 = vld [vmem:[#allocation11 + $0x50] sm:$0xff]  }
 0x22e   :  { %1653 = vrsqrt.f32 %v948_v39  ;;  %v1642_v39 = vld [vmem:[#allocation11 + $0x10] sm:$0xff]  }
 0x239   :  { %v1652_v48 = vpop.eup %1651 }
 0x23b   :  { %v1654_v50 = vpop.eup %1653 }
 0x23c   :  { %v958_v54 = vcombine.low %v1652_v48, %v1654_v50  ;;  %v1646_v48 = vld [vmem:[#allocation11] sm:$0xff]  }
 0x23e   :  { %v972_v29 = vrot.slane %v958_v54, %v1999_v49 }
 0x240   :  { %v973_v60 = vcombine.low %v965_v36, %v972_v29 }
 0x242   :  { %v980_v61 = vrot.slane %v973_v60, %v1999_v49 }
 0x244   :  { %v982_v44 = vmul.f32 %v980_v61, %v918_v55 }
 0x246   :  { %v988_v63 = vrot.slane %v982_v44, %v1964_v28  ;;  %v992_v0 = vrot.slane %v982_v44, %v1967_v59  ;;  %v996_v2 = vrot.slane %v982_v44, %v1992_v16  ;;  %v1000_v3 = vrot.slane %v982_v44, %v935_v46 }
 0x248   :  { %v1005_v4 = vmul.f32 %v988_v63, %v1947_v25  ;;  %v1006_v58 = vmul.f32 %v992_v0, %v1949_v34  ;;  %v1007_v62 = vmul.f32 %v996_v2, %v871_v17  ;;  %v1008_v1 = vmul.f32 %v1000_v3, %v872_v22 }
 0x249   :  { %v1040_v5 = vmul.f32 %v992_v0, %v1940_v37  ;;  %v1039_v41 = vmul.f32 %v988_v63, %v1935_v53  ;;  %v1041_v6 = vmul.f32 %v996_v2, %v1979_v42  ;;  %v1042_v34 = vmul.f32 %v1000_v3, %v1984_v52  ;;  %v1631_v52 = vld [vmem:[#allocation11 + $0x78] sm:$0xff]  }
 0x24a   :  { %v1013_v7 = vcombine.low %v1005_v4, %v1006_v58  ;;  %v1014_v8 = vcombine.low %v1007_v62, %v1008_v1  ;;  %1595 = vmatprep.subr.bf16.mxu0 %v1631_v52 }
 0x24c   :  { %v1021_v9 = vrot.slane %v1013_v7, %v1999_v49  ;;  %v1028_v10 = vrot.slane %v1014_v8, %v1999_v49 }
 0x24e   :  { %v1029_v11 = vcombine.low %v1021_v9, %v1028_v10 }
 0x250   :  { %v1036_v25 = vrot.slane %v1029_v11, %v1999_v49 }
 0x252   :  { %v1038_v13 = vsub.f32 %v983_v12, %v1036_v25 }
 0x254   :  { %v1051_v14 = vrot.slane %v1038_v13, %v1967_v59  ;;  %v1059_v37 = vrot.slane %v1038_v13, %v935_v46  ;;  %v1047_v53 = vrot.slane %v1038_v13, %v1964_v28  ;;  %v1055_v42 = vrot.slane %v1038_v13, %v1992_v16  ;;  %v1632_v46 = vld [vmem:[#allocation11 + $0x38] sm:$0xff]   ;;  %v1634_v16 = vld [vmem:[#allocation11 + $0x30] sm:$0xff]  }
 0x256   :  { %v1065_v15 = vadd.f32 %v1051_v14, %v1040_v5  ;;  %v1067_v17 = vadd.f32 %v1059_v37, %v1042_v34  ;;  %v1064_v18 = vadd.f32 %v1047_v53, %v1039_v41  ;;  %v1066_v19 = vadd.f32 %v1055_v42, %v1041_v6  ;;  %v1254_v34 = vld [vmem:[%s2071_s6] sm:$0x3] }
 0x258   :  { %v1069_v20 = vmax.f32 %v1065_v15, 0.0  ;;  %v1071_v47 = vmax.f32 %v1067_v17, 0.0  ;;  %v1068_v21 = vmax.f32 %v1064_v18, 0.0  ;;  %v1070_v22 = vmax.f32 %v1066_v19, 0.0 }
 0x259   :  { %v1293_v15 = vmul.f32 %v1254_v34, %v1254_v34 }
 0x25a   :  { %v1073_v23 = vpack.c.bf16 %v1069_v20, %v1069_v20  ;;  %v1075_v24 = vpack.c.bf16 %v1071_v47, %v1071_v47  ;;  %v1072_v26 = vpack.c.bf16 %v1068_v21, %v1068_v21  ;;  %v1074_v56 = vpack.c.bf16 %v1070_v22, %v1070_v22 }
 0x25b   :  { %v1298_v52 = vrot.slane %v1293_v15, %v1964_v28 }
 0x25c   :  { %1204 = vmatprep.mubr.bf16.mxu0 %v1073_v23  ;;  %1245 = vmatprep.mubr.bf16.mxu1 %v1075_v24 }
 0x25d   :  { %1205 = vmatmul.mubr.bf16.vlgmr.msra.gmra.mxu0 %v1072_v26  ;;  %1246 = vmatmul.mubr.bf16.vlgmr.msra.gmra.mxu1 %v1074_v56 }
 0x25e   :  { %1596 = vmatpush3.bf16.msra.mxu0 %v1632_v46 }
 0x25f   :  { %1597 = vmatprep.subr.bf16.mxu0 %v1633_v27 }
 0x262   :  { %1598 = vmatpush3.bf16.msra.mxu0 %v1634_v16  ;;  %v1302_v16 = vrot.slane %v1293_v15, %v1967_v59 }
 0x263   :  { %1599 = vmatprep.subr.bf16.mxu0 %v1635_v57 }
 0x266   :  { %1600 = vmatpush3.bf16.msra.mxu0 %v1636_v30 }
 0x267   :  { %1601 = vmatprep.subr.bf16.mxu0 %v1637_v31 }
 0x26a   :  { %1602 = vmatpush3.bf16.msra.mxu0 %v1638_v32 }
 0x26b   :  { %1603 = vmatprep.subr.bf16.mxu0 %v1639_v33 }
 0x26e   :  { %1604 = vmatpush3.bf16.msra.mxu0 %v1640_v35 }
 0x26f   :  { %1605 = vmatprep.subr.bf16.mxu0 %v1641_v38 }
 0x272   :  { %1606 = vmatpush3.bf16.msra.mxu0 %v1642_v39  ;;  %v1291_v39 = vld [vmem:[%s2072_s7] sm:$0x3] }
 0x273   :  { %1607 = vmatprep.subr.bf16.mxu0 %v1643_v40 }
 0x276   :  { %1608 = vmatpush3.bf16.msra.mxu0 %v1644_v43  ;;  %v1292_v43 = vmul.f32 %v1291_v39, %v1254_v34 }
 0x277   :  { %1609 = vmatprep.subr.bf16.mxu0 %v1645_v45 }
 0x27a   :  { %1610 = vmatpush3.bf16.msra.mxu0 %v1646_v48 }
 0x31d   :  { %v1206_v50 = vpop.f32.mrf.mxu0  ;;  %v1247_v54 = vpop.f32.mrf.mxu1 }
 0x31e   :  { %v2026_v51 = vadd.f32 %v1247_v54, %v1206_v50 }
 0x31f   :  { %v1208_v36 = vpop.f32.mrf.mxu0  ;;  %v1249_v29 = vpop.f32.mrf.mxu1 }
 0x320   :  { %v1255_v55 = vrot.slane %v2026_v51, 4  ;;  %v1269_v60 = vmul.f32 %v2026_v51, %v2026_v51  ;;  %v2031_v61 = vadd.f32 %v1249_v29, %v1208_v36 }
 0x321   :  { %v1210_v44 = vpop.f32.mrf.mxu0  ;;  %v1251_v63 = vpop.f32.mrf.mxu1 }
 0x322   :  { %v1256_v0 = vadd.f32 %v1255_v55, %v2026_v51  ;;  %v1271_v2 = vrot.slane %v1269_v60, 4  ;;  %v1261_v3 = vrot.slane %v2031_v61, 4  ;;  %v1270_v4 = vmul.f32 %v2031_v61, %v2031_v61  ;;  %v1330_v63 = vld [vmem:[%s2073_s8] sm:$0x3] }
 0x323   :  { %v1211_v58 = vpop.f32.mrf.mxu0  ;;  %v1252_v62 = vpop.f32.mrf.mxu1 }
 0x324   :  { %v1257_v1 = vrot.slane %v1256_v0, 2  ;;  %v1272_v5 = vadd.f32 %v1271_v2, %v1269_v60  ;;  %v1262_v41 = vadd.f32 %v1261_v3, %v2031_v61  ;;  %v1277_v6 = vrot.slane %v1270_v4, 4 }
 0x326   :  { %v1258_v7 = vadd.f32 %v1257_v1, %v1256_v0  ;;  %v1273_v8 = vrot.slane %v1272_v5, 2  ;;  %v1263_v9 = vrot.slane %v1262_v41, 2  ;;  %v1278_v10 = vadd.f32 %v1277_v6, %v1270_v4 }
 0x328   :  { %v1259_v11 = vrot.slane %v1258_v7, 1  ;;  %v1274_v12 = vadd.f32 %v1273_v8, %v1272_v5  ;;  %v1264_v25 = vadd.f32 %v1263_v9, %v1262_v41  ;;  %v1279_v13 = vrot.slane %v1278_v10, 2 }
 0x32a   :  { %v1260_v14 = vadd.f32 %v1259_v11, %v1258_v7  ;;  %v1275_v37 = vrot.slane %v1274_v12, 1  ;;  %v1265_v53 = vrot.slane %v1264_v25, 1  ;;  %v1280_v42 = vadd.f32 %v1279_v13, %v1278_v10 }
 0x32c   :  { %v1267_v17 = vmul.f32 0.125, %v1260_v14  ;;  %v1276_v18 = vadd.f32 %v1275_v37, %v1274_v12  ;;  %v1266_v19 = vadd.f32 %v1265_v53, %v1264_v25  ;;  %v1281_v20 = vrot.slane %v1280_v42, 1 }
 0x32e   :  { %v1283_v47 = vmul.f32 0.125, %v1276_v18  ;;  %v1285_v21 = vmul.f32 %v1267_v17, %v1267_v17  ;;  %v1282_v22 = vadd.f32 %v1281_v20, %v1280_v42  ;;  %v1268_v23 = vmul.f32 0.125, %v1266_v19 }
 0x330   :  { %v1287_v24 = vsub.f32 %v1283_v47, %v1285_v21  ;;  %v1284_v26 = vmul.f32 0.125, %v1282_v22  ;;  %v1286_v56 = vmul.f32 %v1268_v23, %v1268_v23 }
 0x332   :  { %v1289_v46 = vmax.f32 %v1287_v24, 0.0  ;;  %v1288_v27 = vsub.f32 %v1284_v26, %v1286_v56 }
 0x334   :  { %v1290_v57 = vmax.f32 %v1288_v27, 0.0  ;;  %v1305_v30 = vmul.f32 %v1298_v52, %v1289_v46 }
 0x336   :  { %v1306_v31 = vmul.f32 %v1302_v16, %v1290_v57  ;;  %v1307_v32 = vadd.f32 1e-05, %v1305_v30 }
 0x338   :  { %v1308_v33 = vadd.f32 1e-05, %v1306_v31  ;;  %1655 = vrsqrt.f32 %v1307_v32 }
 0x33a   :  { %1657 = vrsqrt.f32 %v1308_v33 }
 0x345   :  { %v1656_v35 = vpop.eup %1655 }
 0x347   :  { %v1658_v38 = vpop.eup %1657 }
 0x348   :  { %v1313_v40 = vcombine.low %v1656_v35, %v1658_v38 }
 0x34a   :  { %v1320_v45 = vrot.slane %v1313_v40, %v1999_v49 }
 0x34c   :  { %v1327_v48 = vrot.slane %v1320_v45, %v1999_v49 }
 0x34e   :  { %v1329_v50 = vmul.f32 %v1327_v48, %v1292_v43 }
 0x350   :  { %v1335_v54 = vrot.slane %v1329_v50, %v1964_v28  ;;  %v1339_v36 = vrot.slane %v1329_v50, %v1967_v59 }
 0x352   :  { %v1342_v29 = vmul.f32 %v1335_v54, %v1267_v17  ;;  %v1343_v55 = vmul.f32 %v1339_v36, %v1268_v23  ;;  %v1364_v3 = vmul.f32 %v1339_v36, %v2031_v61  ;;  %v1363_v58 = vmul.f32 %v1335_v54, %v2026_v51 }
 0x354   :  { %v1346_v60 = vcombine.low %v1342_v29, %v1343_v55 }
 0x356   :  { %v1353_v44 = vrot.slane %v1346_v60, %v1999_v49 }
 0x358   :  { %v1360_v0 = vrot.slane %v1353_v44, %v1999_v49  ;;  %v1578_v49 = vld [vmem:[%s2075_s10] ss:$0 sm:$0xff] }
 0x35a   :  { %v1362_v2 = vsub.f32 %v1330_v63, %v1360_v0 }
 0x35c   :  { %v1373_v4 = vrot.slane %v1362_v2, %v1967_v59  ;;  %v1369_v62 = vrot.slane %v1362_v2, %v1964_v28 }
 0x35e   :  { %v1377_v1 = vadd.f32 %v1373_v4, %v1364_v3  ;;  %v1376_v5 = vadd.f32 %v1369_v62, %v1363_v58 }
 0x360   :  { %v1379_v41 = vmax.f32 %v1377_v1, 0.0  ;;  %v1378_v6 = vmax.f32 %v1376_v5, 0.0 }
 0x362   :  { %v1381_v7 = vpack.c.bf16 %v1379_v41, %v1379_v41  ;;  %v1380_v8 = vpack.c.bf16 %v1378_v6, %v1378_v6 }
 0x364   :  { %1549 = vmatprep.mubr.bf16.mxu0 %v1381_v7 }
 0x365   :  { %1550 = vmatmul.mubr.bf16.vlgmr.msra.gmra.mxu0 %v1380_v8 }
 0x425   :  { %v1611_v9 = vpop.f32.mrf.mxu0 }
 0x427   :  { %v1612_v61 = vpop.f32.mrf.mxu0 }
 0x428   :  { %v1613_v10 = vadd.f32 %v1612_v61, %v1611_v9 }
 0x429   :  { %v1614_v59 = vpop.f32.mrf.mxu0 }
 0x42a   :  { %v1552_v11 = vadd.f32 %v1613_v10, %v1578_v49 }
 0x42b   :  { %v1615_v51 = vpop.f32.mrf.mxu0 }
 0x42c   :  { %1659 = vtanh.f32 %v1552_v11 }
 0x439   :  { %v1660_v28 = vpop.eup %1659 }
 0x43a   :  { %v1558_v12 = vpack.c.bf16 %v1660_v28, %v1660_v28 }
 0x43c   :  { %1559 = vst [vmem:[#allocation13] sm:$0xf] %v1558_v12 }
 0x43d   :  { %1792 = shalt.err (!%p1789_p6)
}
 0x43e   :  { %1569 = dma.vmem_to_hbm [thread:$0]  %s1567_s15, 64, %s2076_s11, [#allocation4]  }
 0x43f   :  { %1809 = dma.done.wait [#allocation4], 64  }
 0x440   :  { %1810 = vsyncadd [#allocation4], 4294967232 }
 0x441   :  { %1573 = vsyncpa [#allocation3], 1 }
 0x442   :  { %1574 = vsyncpa [#allocation6], 1 }
 0x443   :  { %1575 = vsyncpa [#allocation9], 1 }
 0x444   :  { %1576 = vsyncpa [#allocation12], 1 }
 0x445   :  { %1577 = vsyncpa [#allocation4], 1 }

</bundles_post_ra>
